<compile_context>
chip_gen: v6e
topology: v6e:2x2x1
jax: 0.10.0
libtpu: 0.0.40
codegen_flags: <defaults>
</compile_context>

<pallas_src>
import functools
import numpy as np
import jax
import jax.numpy as jnp
from jax.experimental import pallas as pl
from jax.experimental.pallas import tpu as pltpu


# ----------------------------------------------------------------------------
# Pallas kernel: whole forward for one batch row
# ----------------------------------------------------------------------------
def _layer_norm(x, gamma, beta, eps=1e-5):
    mean = jnp.mean(x, axis=-1, keepdims=True)
    var = jnp.mean((x - mean) ** 2, axis=-1, keepdims=True)
    return (x - mean) * jax.lax.rsqrt(var + eps) * gamma + beta


def fused_transformer_kernel(
    x_ref,
    wq_ref, bq_ref, wk_ref, bk_ref, wv_ref, bv_ref, wo_ref, bo_ref,
    g1_ref, be1_ref,
    w1_ref, b1_ref, w2_ref, b2_ref,
    g2_ref, be2_ref,
    fcw_ref, fcb_ref,
    out_ref,
    *, n_layers, n_heads,
):
    x = x_ref[0]                              # (S, D) — stays in VMEM for all layers
    S, D = x.shape
    d_k = D // n_heads
    scale = 1.0 / np.sqrt(d_k)

    for l in range(n_layers):                 # static unroll over layers (compile-time)
        wq, bq = wq_ref[l], bq_ref[l]
        wk, bk = wk_ref[l], bk_ref[l]
        wv, bv = wv_ref[l], bv_ref[l]
        wo, bo = wo_ref[l], bo_ref[l]
        g1, be1 = g1_ref[l], be1_ref[l]
        w1, b1 = w1_ref[l], b1_ref[l]
        w2, b2 = w2_ref[l], b2_ref[l]
        g2, be2 = g2_ref[l], be2_ref[l]

        # ---- Multi-head attention: QKV projections (full-width MXU matmuls) ----
        q = jnp.dot(x, wq, preferred_element_type=jnp.float32) + bq      # (S, D)
        k = jnp.dot(x, wk, preferred_element_type=jnp.float32) + bk
        v = jnp.dot(x, wv, preferred_element_type=jnp.float32) + bv

        # Heads as leading batch dim of a single batched matmul pair.
        qh = jnp.stack([q[:, h * d_k:(h + 1) * d_k] for h in range(n_heads)], axis=0)
        kh = jnp.stack([k[:, h * d_k:(h + 1) * d_k] for h in range(n_heads)], axis=0)
        vh = jnp.stack([v[:, h * d_k:(h + 1) * d_k] for h in range(n_heads)], axis=0)

        scores = jnp.einsum("hqd,hkd->hqk", qh, kh,
                            preferred_element_type=jnp.float32) * scale   # (H, S, S)
        scores = scores - jnp.max(scores, axis=-1, keepdims=True)
        e = jnp.exp(scores)
        denom = jnp.sum(e, axis=-1, keepdims=True)
        attn = e * pl.reciprocal(denom, approx=True)                      # EUP reciprocal
        ctx = jnp.einsum("hqk,hkd->hqd", attn, vh,
                         preferred_element_type=jnp.float32)              # (H, S, d_k)
        ctx = jnp.concatenate([ctx[h] for h in range(n_heads)], axis=-1)  # (S, D)

        attn_out = jnp.dot(ctx, wo, preferred_element_type=jnp.float32) + bo

        # residual + LayerNorm 1
        x = _layer_norm(x + attn_out, g1, be1)

        # ---- Feed-forward ----
        h1 = jnp.dot(x, w1, preferred_element_type=jnp.float32) + b1
        h1 = jnp.maximum(h1, 0.0)
        ffn = jnp.dot(h1, w2, preferred_element_type=jnp.float32) + b2

        # residual + LayerNorm 2
        x = _layer_norm(x + ffn, g2, be2)

    # ---- Classifier head: mean-pool over sequence, Linear, Sigmoid ----
    pooled = jnp.mean(x, axis=0, keepdims=True)                           # (1, D)
    logits = jnp.dot(pooled, fcw_ref[...],
                     preferred_element_type=jnp.float32) + fcb_ref[...]   # (1, C)
    out_ref[0] = jax.nn.sigmoid(logits)


# ----------------------------------------------------------------------------
# Wrapper
# ----------------------------------------------------------------------------
_LAYER_PARAM_NAMES = ["wq", "bq", "wk", "bk", "wv", "bv", "wo", "bo",
                      "g1", "be1", "w1", "b1", "w2", "b2", "g2", "be2"]


def custom_transformer_forward(input_ids, params):
    # Embedding lookup + positional encoding (plain JAX glue).
    B, S = input_ids.shape
    x = params["embedding"][input_ids] + params["pos_enc"][:, :S, :]
    x = x.astype(jnp.float32)
    D = x.shape[-1]

    n_heads = params["n_heads"]
    layers = params["layers"]
    n_layers = len(layers)
    C = params["fc_w"].shape[1]

    # Stack every per-layer parameter along a leading layer axis so the whole
    # network's weights are passed once and stay VMEM-resident.
    stacked = [jnp.stack([lp[n] for lp in layers], axis=0) for n in _LAYER_PARAM_NAMES]
    weights = stacked + [params["fc_w"], params["fc_b"]]

    def const_spec(shape):
        nd = len(shape)
        return pl.BlockSpec(shape, lambda b, _nd=nd: (0,) * _nd)

    kernel = functools.partial(fused_transformer_kernel,
                               n_layers=n_layers, n_heads=n_heads)

    out = pl.pallas_call(
        kernel,
        out_shape=jax.ShapeDtypeStruct((B, 1, C), jnp.float32),
        grid=(B,),
        in_specs=[pl.BlockSpec((1, S, D), lambda b: (b, 0, 0))] +
                 [const_spec(w.shape) for w in weights],
        out_specs=pl.BlockSpec((1, 1, C), lambda b: (b, 0, 0)),
        compiler_params=pltpu.CompilerParams(dimension_semantics=("parallel",)),
    )(x, *weights)
    return out[:, 0, :]                                                   # (B, C)


# ----------------------------------------------------------------------------
# Deterministic parameter construction
# ----------------------------------------------------------------------------
def init_params(key, vocab_size, d_model, n_heads, n_layers, max_len, num_classes):
    def dense(k, din, dout, scale=0.05):
        kw, kb = jax.random.split(k)
        w = jax.random.normal(kw, (din, dout), jnp.float32) * scale       # (in, out)
        b = jax.random.normal(kb, (1, dout), jnp.float32) * scale
        return w, b

    keys = jax.random.split(key, 3 + n_layers)
    params = {
        "n_heads": n_heads,
        "embedding": jax.random.normal(keys[0], (vocab_size, d_model), jnp.float32) * 0.05,
        "pos_enc": jax.random.normal(keys[1], (1, max_len, d_model), jnp.float32) * 0.05,
        "layers": [],
    }
    fc_w, fc_b = dense(keys[2], d_model, num_classes)
    params["fc_w"], params["fc_b"] = fc_w, fc_b

    for li in range(n_layers):
        lk = jax.random.split(keys[3 + li], 6)
        wq, bq = dense(lk[0], d_model, d_model)
        wk, bk = dense(lk[1], d_model, d_model)
        wv, bv = dense(lk[2], d_model, d_model)
        wo, bo = dense(lk[3], d_model, d_model)
        w1, b1 = dense(lk[4], d_model, 4 * d_model)
        w2, b2 = dense(lk[5], 4 * d_model, d_model)
        params["layers"].append({
            "wq": wq, "bq": bq, "wk": wk, "bk": bk, "wv": wv, "bv": bv,
            "wo": wo, "bo": bo,
            "g1": jnp.ones((1, d_model), jnp.float32),
            "be1": jnp.zeros((1, d_model), jnp.float32),
            "w1": w1, "b1": b1, "w2": w2, "b2": b2,
            "g2": jnp.ones((1, d_model), jnp.float32),
            "be2": jnp.zeros((1, d_model), jnp.float32),
        })
    return params


# ----------------------------------------------------------------------------
# Pure-JAX reference (sanity check only)
# ----------------------------------------------------------------------------
def reference_forward(input_ids, params):
    def ln(x, g, b, eps=1e-5):
        m = jnp.mean(x, -1, keepdims=True)
        v = jnp.mean((x - m) ** 2, -1, keepdims=True)
        return (x - m) / jnp.sqrt(v + eps) * g + b

    n_heads = params["n_heads"]
    S = input_ids.shape[1]
    x = params["embedding"][input_ids] + params["pos_enc"][:, :S, :]
    for p in params["layers"]:
        B, S, D = x.shape
        d_k = D // n_heads
        q = (x @ p["wq"] + p["bq"]).reshape(B, S, n_heads, d_k).transpose(0, 2, 1, 3)
        k = (x @ p["wk"] + p["bk"]).reshape(B, S, n_heads, d_k).transpose(0, 2, 1, 3)
        v = (x @ p["wv"] + p["bv"]).reshape(B, S, n_heads, d_k).transpose(0, 2, 1, 3)
        scores = jnp.einsum("bhqd,bhkd->bhqk", q, k) / np.sqrt(d_k)
        attn = jax.nn.softmax(scores, axis=-1)
        ctx = jnp.einsum("bhqk,bhkd->bhqd", attn, v).transpose(0, 2, 1, 3).reshape(B, S, D)
        attn_out = ctx @ p["wo"] + p["bo"]
        x = ln(x + attn_out, p["g1"], p["be1"])
        ffn = jnp.maximum(x @ p["w1"] + p["b1"], 0.0) @ p["w2"] + p["b2"]
        x = ln(x + ffn, p["g2"], p["be2"])
    pooled = x.mean(axis=1)
    return jax.nn.sigmoid(pooled @ params["fc_w"] + params["fc_b"])


# ----------------------------------------------------------------------------
if __name__ == "__main__":
    vocab_size, d_model, n_heads, n_layers = 50, 32, 4, 2
    max_len, num_classes = 16, 8
    batch, seq = 2, 8

    key = jax.random.PRNGKey(0)
    k_params, k_ids = jax.random.split(key)
    params = init_params(k_params, vocab_size, d_model, n_heads, n_layers,
                         max_len, num_classes)
    input_ids = jax.random.randint(k_ids, (batch, seq), 0, vocab_size, jnp.int32)

    out = custom_transformer_forward(input_ids, params)
    out = jax.block_until_ready(out)

    ref = jax.block_until_ready(reference_forward(input_ids, params))
    np.testing.assert_allclose(np.asarray(out), np.asarray(ref), rtol=1e-2, atol=1e-2)

    print("KERNEL_OK")
</pallas_src>

<mosaic_0001>
module attributes {stable_mosaic.version = 11 : i64} {
  func.func @fused_transformer_kernel(%arg0: i32, %arg1: memref<1x8x32xf32, #tpu.memory_space<vmem>>, %arg2: memref<2x32x32xf32, #tpu.memory_space<vmem>>, %arg3: memref<2x1x32xf32, #tpu.memory_space<vmem>>, %arg4: memref<2x32x32xf32, #tpu.memory_space<vmem>>, %arg5: memref<2x1x32xf32, #tpu.memory_space<vmem>>, %arg6: memref<2x32x32xf32, #tpu.memory_space<vmem>>, %arg7: memref<2x1x32xf32, #tpu.memory_space<vmem>>, %arg8: memref<2x32x32xf32, #tpu.memory_space<vmem>>, %arg9: memref<2x1x32xf32, #tpu.memory_space<vmem>>, %arg10: memref<2x1x32xf32, #tpu.memory_space<vmem>>, %arg11: memref<2x1x32xf32, #tpu.memory_space<vmem>>, %arg12: memref<2x32x128xf32, #tpu.memory_space<vmem>>, %arg13: memref<2x1x128xf32, #tpu.memory_space<vmem>>, %arg14: memref<2x128x32xf32, #tpu.memory_space<vmem>>, %arg15: memref<2x1x32xf32, #tpu.memory_space<vmem>>, %arg16: memref<2x1x32xf32, #tpu.memory_space<vmem>>, %arg17: memref<2x1x32xf32, #tpu.memory_space<vmem>>, %arg18: memref<32x8xf32, #tpu.memory_space<vmem>>, %arg19: memref<1x8xf32, #tpu.memory_space<vmem>>, %arg20: memref<1x1x8xf32, #tpu.memory_space<vmem>>) attributes {dimension_semantics = [#tpu.dimension_semantics<parallel>], iteration_bounds = array<i64: 2>, scalar_prefetch = 0 : i64, scratch_operands = 0 : i64, tpu.core_type = #tpu.core_type<tc>, window_params = [{transform_indices = @transform_0, window_bounds = array<i64: 1, 8, 32>}, {pipeline_mode = #tpu.pipeline_mode<synchronous>, transform_indices = @transform_1, window_bounds = array<i64: 2, 32, 32>}, {pipeline_mode = #tpu.pipeline_mode<synchronous>, transform_indices = @transform_2, window_bounds = array<i64: 2, 1, 32>}, {pipeline_mode = #tpu.pipeline_mode<synchronous>, transform_indices = @transform_3, window_bounds = array<i64: 2, 32, 32>}, {pipeline_mode = #tpu.pipeline_mode<synchronous>, transform_indices = @transform_4, window_bounds = array<i64: 2, 1, 32>}, {pipeline_mode = #tpu.pipeline_mode<synchronous>, transform_indices = @transform_5, window_bounds = array<i64: 2, 32, 32>}, {pipeline_mode = #tpu.pipeline_mode<synchronous>, transform_indices = @transform_6, window_bounds = array<i64: 2, 1, 32>}, {pipeline_mode = #tpu.pipeline_mode<synchronous>, transform_indices = @transform_7, window_bounds = array<i64: 2, 32, 32>}, {pipeline_mode = #tpu.pipeline_mode<synchronous>, transform_indices = @transform_8, window_bounds = array<i64: 2, 1, 32>}, {pipeline_mode = #tpu.pipeline_mode<synchronous>, transform_indices = @transform_9, window_bounds = array<i64: 2, 1, 32>}, {pipeline_mode = #tpu.pipeline_mode<synchronous>, transform_indices = @transform_10, window_bounds = array<i64: 2, 1, 32>}, {pipeline_mode = #tpu.pipeline_mode<synchronous>, transform_indices = @transform_11, window_bounds = array<i64: 2, 32, 128>}, {pipeline_mode = #tpu.pipeline_mode<synchronous>, transform_indices = @transform_12, window_bounds = array<i64: 2, 1, 128>}, {pipeline_mode = #tpu.pipeline_mode<synchronous>, transform_indices = @transform_13, window_bounds = array<i64: 2, 128, 32>}, {pipeline_mode = #tpu.pipeline_mode<synchronous>, transform_indices = @transform_14, window_bounds = array<i64: 2, 1, 32>}, {pipeline_mode = #tpu.pipeline_mode<synchronous>, transform_indices = @transform_15, window_bounds = array<i64: 2, 1, 32>}, {pipeline_mode = #tpu.pipeline_mode<synchronous>, transform_indices = @transform_16, window_bounds = array<i64: 2, 1, 32>}, {pipeline_mode = #tpu.pipeline_mode<synchronous>, transform_indices = @transform_17, window_bounds = array<i64: 32, 8>}, {pipeline_mode = #tpu.pipeline_mode<synchronous>, transform_indices = @transform_18, window_bounds = array<i64: 1, 8>}, {transform_indices = @transform_19, window_bounds = array<i64: 1, 1, 8>}]} {
    %c0 = arith.constant 0 : index
    %c0_0 = arith.constant 0 : index
    %c0_1 = arith.constant 0 : index
    %0 = vector.load %arg1[%c0, %c0_0, %c0_1] : memref<1x8x32xf32, #tpu.memory_space<vmem>>, vector<1x8x32xf32>
    %1 = vector.shape_cast %0 : vector<1x8x32xf32> to vector<8x32xf32>
    %c0_2 = arith.constant 0 : index
    %c0_3 = arith.constant 0 : index
    %c0_4 = arith.constant 0 : index
    %2 = vector.load %arg2[%c0_2, %c0_3, %c0_4] : memref<2x32x32xf32, #tpu.memory_space<vmem>>, vector<1x32x32xf32>
    %3 = vector.shape_cast %2 : vector<1x32x32xf32> to vector<32x32xf32>
    %c0_5 = arith.constant 0 : index
    %c0_6 = arith.constant 0 : index
    %c0_7 = arith.constant 0 : index
    %4 = vector.load %arg3[%c0_5, %c0_6, %c0_7] : memref<2x1x32xf32, #tpu.memory_space<vmem>>, vector<1x1x32xf32>
    %5 = vector.shape_cast %4 : vector<1x1x32xf32> to vector<1x32xf32>
    %c0_8 = arith.constant 0 : index
    %c0_9 = arith.constant 0 : index
    %c0_10 = arith.constant 0 : index
    %6 = vector.load %arg4[%c0_8, %c0_9, %c0_10] : memref<2x32x32xf32, #tpu.memory_space<vmem>>, vector<1x32x32xf32>
    %7 = vector.shape_cast %6 : vector<1x32x32xf32> to vector<32x32xf32>
    %c0_11 = arith.constant 0 : index
    %c0_12 = arith.constant 0 : index
    %c0_13 = arith.constant 0 : index
    %8 = vector.load %arg5[%c0_11, %c0_12, %c0_13] : memref<2x1x32xf32, #tpu.memory_space<vmem>>, vector<1x1x32xf32>
    %9 = vector.shape_cast %8 : vector<1x1x32xf32> to vector<1x32xf32>
    %c0_14 = arith.constant 0 : index
    %c0_15 = arith.constant 0 : index
    %c0_16 = arith.constant 0 : index
    %10 = vector.load %arg6[%c0_14, %c0_15, %c0_16] : memref<2x32x32xf32, #tpu.memory_space<vmem>>, vector<1x32x32xf32>
    %11 = vector.shape_cast %10 : vector<1x32x32xf32> to vector<32x32xf32>
    %c0_17 = arith.constant 0 : index
    %c0_18 = arith.constant 0 : index
    %c0_19 = arith.constant 0 : index
    %12 = vector.load %arg7[%c0_17, %c0_18, %c0_19] : memref<2x1x32xf32, #tpu.memory_space<vmem>>, vector<1x1x32xf32>
    %13 = vector.shape_cast %12 : vector<1x1x32xf32> to vector<1x32xf32>
    %c0_20 = arith.constant 0 : index
    %c0_21 = arith.constant 0 : index
    %c0_22 = arith.constant 0 : index
    %14 = vector.load %arg8[%c0_20, %c0_21, %c0_22] : memref<2x32x32xf32, #tpu.memory_space<vmem>>, vector<1x32x32xf32>
    %15 = vector.shape_cast %14 : vector<1x32x32xf32> to vector<32x32xf32>
    %c0_23 = arith.constant 0 : index
    %c0_24 = arith.constant 0 : index
    %c0_25 = arith.constant 0 : index
    %16 = vector.load %arg9[%c0_23, %c0_24, %c0_25] : memref<2x1x32xf32, #tpu.memory_space<vmem>>, vector<1x1x32xf32>
    %17 = vector.shape_cast %16 : vector<1x1x32xf32> to vector<1x32xf32>
    %c0_26 = arith.constant 0 : index
    %c0_27 = arith.constant 0 : index
    %c0_28 = arith.constant 0 : index
    %18 = vector.load %arg10[%c0_26, %c0_27, %c0_28] : memref<2x1x32xf32, #tpu.memory_space<vmem>>, vector<1x1x32xf32>
    %19 = vector.shape_cast %18 : vector<1x1x32xf32> to vector<1x32xf32>
    %c0_29 = arith.constant 0 : index
    %c0_30 = arith.constant 0 : index
    %c0_31 = arith.constant 0 : index
    %20 = vector.load %arg11[%c0_29, %c0_30, %c0_31] : memref<2x1x32xf32, #tpu.memory_space<vmem>>, vector<1x1x32xf32>
    %21 = vector.shape_cast %20 : vector<1x1x32xf32> to vector<1x32xf32>
    %c0_32 = arith.constant 0 : index
    %c0_33 = arith.constant 0 : index
    %c0_34 = arith.constant 0 : index
    %22 = vector.load %arg12[%c0_32, %c0_33, %c0_34] : memref<2x32x128xf32, #tpu.memory_space<vmem>>, vector<1x32x128xf32>
    %23 = vector.shape_cast %22 : vector<1x32x128xf32> to vector<32x128xf32>
    %c0_35 = arith.constant 0 : index
    %c0_36 = arith.constant 0 : index
    %c0_37 = arith.constant 0 : index
    %24 = vector.load %arg13[%c0_35, %c0_36, %c0_37] : memref<2x1x128xf32, #tpu.memory_space<vmem>>, vector<1x1x128xf32>
    %25 = vector.shape_cast %24 : vector<1x1x128xf32> to vector<1x128xf32>
    %c0_38 = arith.constant 0 : index
    %c0_39 = arith.constant 0 : index
    %c0_40 = arith.constant 0 : index
    %26 = vector.load %arg14[%c0_38, %c0_39, %c0_40] : memref<2x128x32xf32, #tpu.memory_space<vmem>>, vector<1x128x32xf32>
    %27 = vector.shape_cast %26 : vector<1x128x32xf32> to vector<128x32xf32>
    %c0_41 = arith.constant 0 : index
    %c0_42 = arith.constant 0 : index
    %c0_43 = arith.constant 0 : index
    %28 = vector.load %arg15[%c0_41, %c0_42, %c0_43] : memref<2x1x32xf32, #tpu.memory_space<vmem>>, vector<1x1x32xf32>
    %29 = vector.shape_cast %28 : vector<1x1x32xf32> to vector<1x32xf32>
    %c0_44 = arith.constant 0 : index
    %c0_45 = arith.constant 0 : index
    %c0_46 = arith.constant 0 : index
    %30 = vector.load %arg16[%c0_44, %c0_45, %c0_46] : memref<2x1x32xf32, #tpu.memory_space<vmem>>, vector<1x1x32xf32>
    %31 = vector.shape_cast %30 : vector<1x1x32xf32> to vector<1x32xf32>
    %c0_47 = arith.constant 0 : index
    %c0_48 = arith.constant 0 : index
    %c0_49 = arith.constant 0 : index
    %32 = vector.load %arg17[%c0_47, %c0_48, %c0_49] : memref<2x1x32xf32, #tpu.memory_space<vmem>>, vector<1x1x32xf32>
    %33 = vector.shape_cast %32 : vector<1x1x32xf32> to vector<1x32xf32>
    %cst = arith.constant dense<0.000000e+00> : vector<8x32xf32>
    %34 = tpu.matmul %1, %3, %cst {dimension_numbers = #tpu.dot_dimension_numbers<[1], [0], [0], [1], [0, 0, 1, 1], [], []>} : vector<8x32xf32>, vector<32x32xf32>, vector<8x32xf32> -> vector<8x32xf32>
    %35 = vector.broadcast %5 : vector<1x32xf32> to vector<8x32xf32>
    %36 = arith.addf %34, %35 : vector<8x32xf32>
    %cst_50 = arith.constant dense<0.000000e+00> : vector<8x32xf32>
    %37 = tpu.matmul %1, %7, %cst_50 {dimension_numbers = #tpu.dot_dimension_numbers<[1], [0], [0], [1], [0, 0, 1, 1], [], []>} : vector<8x32xf32>, vector<32x32xf32>, vector<8x32xf32> -> vector<8x32xf32>
    %38 = vector.broadcast %9 : vector<1x32xf32> to vector<8x32xf32>
    %39 = arith.addf %37, %38 : vector<8x32xf32>
    %cst_51 = arith.constant dense<0.000000e+00> : vector<8x32xf32>
    %40 = tpu.matmul %1, %11, %cst_51 {dimension_numbers = #tpu.dot_dimension_numbers<[1], [0], [0], [1], [0, 0, 1, 1], [], []>} : vector<8x32xf32>, vector<32x32xf32>, vector<8x32xf32> -> vector<8x32xf32>
    %41 = vector.broadcast %13 : vector<1x32xf32> to vector<8x32xf32>
    %42 = arith.addf %40, %41 : vector<8x32xf32>
    %43 = vector.extract_strided_slice %36 {offsets = [0, 0], sizes = [8, 8], strides = [1, 1]} : vector<8x32xf32> to vector<8x8xf32>
    %44 = vector.extract_strided_slice %36 {offsets = [0, 8], sizes = [8, 8], strides = [1, 1]} : vector<8x32xf32> to vector<8x8xf32>
    %45 = vector.extract_strided_slice %36 {offsets = [0, 16], sizes = [8, 8], strides = [1, 1]} : vector<8x32xf32> to vector<8x8xf32>
    %46 = vector.extract_strided_slice %36 {offsets = [0, 24], sizes = [8, 8], strides = [1, 1]} : vector<8x32xf32> to vector<8x8xf32>
    %47 = vector.shape_cast %43 : vector<8x8xf32> to vector<1x8x8xf32>
    %48 = vector.shape_cast %44 : vector<8x8xf32> to vector<1x8x8xf32>
    %49 = vector.shape_cast %45 : vector<8x8xf32> to vector<1x8x8xf32>
    %50 = vector.shape_cast %46 : vector<8x8xf32> to vector<1x8x8xf32>
    %51 = tpu.concatenate %47, %48, %49, %50 in 0 : vector<1x8x8xf32>, vector<1x8x8xf32>, vector<1x8x8xf32>, vector<1x8x8xf32> -> vector<4x8x8xf32>
    %52 = vector.extract_strided_slice %39 {offsets = [0, 0], sizes = [8, 8], strides = [1, 1]} : vector<8x32xf32> to vector<8x8xf32>
    %53 = vector.extract_strided_slice %39 {offsets = [0, 8], sizes = [8, 8], strides = [1, 1]} : vector<8x32xf32> to vector<8x8xf32>
    %54 = vector.extract_strided_slice %39 {offsets = [0, 16], sizes = [8, 8], strides = [1, 1]} : vector<8x32xf32> to vector<8x8xf32>
    %55 = vector.extract_strided_slice %39 {offsets = [0, 24], sizes = [8, 8], strides = [1, 1]} : vector<8x32xf32> to vector<8x8xf32>
    %56 = vector.shape_cast %52 : vector<8x8xf32> to vector<1x8x8xf32>
    %57 = vector.shape_cast %53 : vector<8x8xf32> to vector<1x8x8xf32>
    %58 = vector.shape_cast %54 : vector<8x8xf32> to vector<1x8x8xf32>
    %59 = vector.shape_cast %55 : vector<8x8xf32> to vector<1x8x8xf32>
    %60 = tpu.concatenate %56, %57, %58, %59 in 0 : vector<1x8x8xf32>, vector<1x8x8xf32>, vector<1x8x8xf32>, vector<1x8x8xf32> -> vector<4x8x8xf32>
    %61 = vector.extract_strided_slice %42 {offsets = [0, 0], sizes = [8, 8], strides = [1, 1]} : vector<8x32xf32> to vector<8x8xf32>
    %62 = vector.extract_strided_slice %42 {offsets = [0, 8], sizes = [8, 8], strides = [1, 1]} : vector<8x32xf32> to vector<8x8xf32>
    %63 = vector.extract_strided_slice %42 {offsets = [0, 16], sizes = [8, 8], strides = [1, 1]} : vector<8x32xf32> to vector<8x8xf32>
    %64 = vector.extract_strided_slice %42 {offsets = [0, 24], sizes = [8, 8], strides = [1, 1]} : vector<8x32xf32> to vector<8x8xf32>
    %65 = vector.shape_cast %61 : vector<8x8xf32> to vector<1x8x8xf32>
    %66 = vector.shape_cast %62 : vector<8x8xf32> to vector<1x8x8xf32>
    %67 = vector.shape_cast %63 : vector<8x8xf32> to vector<1x8x8xf32>
    %68 = vector.shape_cast %64 : vector<8x8xf32> to vector<1x8x8xf32>
    %69 = tpu.concatenate %65, %66, %67, %68 in 0 : vector<1x8x8xf32>, vector<1x8x8xf32>, vector<1x8x8xf32>, vector<1x8x8xf32> -> vector<4x8x8xf32>
    "tpu.trace_start"() <{level = 10 : i32, message = "hqd,hkd->hqk"}> : () -> ()
    %cst_52 = arith.constant dense<0.000000e+00> : vector<4x8x8xf32>
    %70 = tpu.matmul %51, %60, %cst_52 {dimension_numbers = #tpu.dot_dimension_numbers<[2], [2], [1], [1], [0, 0, 0, 1, 1, 1], [0], [0]>} : vector<4x8x8xf32>, vector<4x8x8xf32>, vector<4x8x8xf32> -> vector<4x8x8xf32>
    "tpu.trace_stop"() : () -> ()
    %cst_53 = arith.constant 0.353553385 : f32
    %71 = vector.broadcast %cst_53 : f32 to vector<4x8x8xf32>
    %72 = arith.mulf %70, %71 : vector<4x8x8xf32>
    %cst_54 = arith.constant dense<0xFF800000> : vector<4x8xf32>
    %73 = vector.multi_reduction <maximumf>, %72, %cst_54 [2] : vector<4x8x8xf32> to vector<4x8xf32>
    %74 = vector.shape_cast %73 : vector<4x8xf32> to vector<4x8x1xf32>
    %75 = vector.broadcast %74 : vector<4x8x1xf32> to vector<4x8x8xf32>
    %76 = arith.subf %72, %75 : vector<4x8x8xf32>
    %77 = math.exp %76 : vector<4x8x8xf32>
    %cst_55 = arith.constant dense<0.000000e+00> : vector<4x8xf32>
    %78 = vector.multi_reduction <add>, %77, %cst_55 [2] : vector<4x8x8xf32> to vector<4x8xf32>
    %79 = vector.shape_cast %78 : vector<4x8xf32> to vector<4x8x1xf32>
    %80 = tpu.reciprocal %79 {approx = true} : vector<4x8x1xf32> -> vector<4x8x1xf32>
    %81 = vector.broadcast %80 : vector<4x8x1xf32> to vector<4x8x8xf32>
    %82 = arith.mulf %77, %81 : vector<4x8x8xf32>
    "tpu.trace_start"() <{level = 10 : i32, message = "hqk,hkd->hqd"}> : () -> ()
    %cst_56 = arith.constant dense<0.000000e+00> : vector<4x8x8xf32>
    %83 = tpu.matmul %82, %69, %cst_56 {dimension_numbers = #tpu.dot_dimension_numbers<[2], [1], [1], [2], [0, 0, 0, 1, 1, 2], [0], [0]>} : vector<4x8x8xf32>, vector<4x8x8xf32>, vector<4x8x8xf32> -> vector<4x8x8xf32>
    "tpu.trace_stop"() : () -> ()
    %84 = vector.extract_strided_slice %83 {offsets = [0, 0, 0], sizes = [1, 8, 8], strides = [1, 1, 1]} : vector<4x8x8xf32> to vector<1x8x8xf32>
    %85 = vector.shape_cast %84 : vector<1x8x8xf32> to vector<8x8xf32>
    %86 = vector.extract_strided_slice %83 {offsets = [1, 0, 0], sizes = [1, 8, 8], strides = [1, 1, 1]} : vector<4x8x8xf32> to vector<1x8x8xf32>
    %87 = vector.shape_cast %86 : vector<1x8x8xf32> to vector<8x8xf32>
    %88 = vector.extract_strided_slice %83 {offsets = [2, 0, 0], sizes = [1, 8, 8], strides = [1, 1, 1]} : vector<4x8x8xf32> to vector<1x8x8xf32>
    %89 = vector.shape_cast %88 : vector<1x8x8xf32> to vector<8x8xf32>
    %90 = vector.extract_strided_slice %83 {offsets = [3, 0, 0], sizes = [1, 8, 8], strides = [1, 1, 1]} : vector<4x8x8xf32> to vector<1x8x8xf32>
    %91 = vector.shape_cast %90 : vector<1x8x8xf32> to vector<8x8xf32>
    %92 = tpu.concatenate %85, %87, %89, %91 in 1 : vector<8x8xf32>, vector<8x8xf32>, vector<8x8xf32>, vector<8x8xf32> -> vector<8x32xf32>
    %cst_57 = arith.constant dense<0.000000e+00> : vector<8x32xf32>
    %93 = tpu.matmul %92, %15, %cst_57 {dimension_numbers = #tpu.dot_dimension_numbers<[1], [0], [0], [1], [0, 0, 1, 1], [], []>} : vector<8x32xf32>, vector<32x32xf32>, vector<8x32xf32> -> vector<8x32xf32>
    %94 = vector.broadcast %17 : vector<1x32xf32> to vector<8x32xf32>
    %95 = arith.addf %93, %94 : vector<8x32xf32>
    %96 = arith.addf %1, %95 : vector<8x32xf32>
    %cst_58 = arith.constant dense<0.000000e+00> : vector<8xf32>
    %97 = vector.multi_reduction <add>, %96, %cst_58 [1] : vector<8x32xf32> to vector<8xf32>
    %98 = vector.shape_cast %97 : vector<8xf32> to vector<8x1xf32>
    %cst_59 = arith.constant 3.200000e+01 : f32
    %99 = vector.broadcast %cst_59 : f32 to vector<8x1xf32>
    %100 = arith.divf %98, %99 : vector<8x1xf32>
    %101 = vector.broadcast %100 : vector<8x1xf32> to vector<8x32xf32>
    %102 = arith.subf %96, %101 : vector<8x32xf32>
    %103 = arith.mulf %102, %102 : vector<8x32xf32>
    %cst_60 = arith.constant dense<0.000000e+00> : vector<8xf32>
    %104 = vector.multi_reduction <add>, %103, %cst_60 [1] : vector<8x32xf32> to vector<8xf32>
    %105 = vector.shape_cast %104 : vector<8xf32> to vector<8x1xf32>
    %cst_61 = arith.constant 3.200000e+01 : f32
    %106 = vector.broadcast %cst_61 : f32 to vector<8x1xf32>
    %107 = arith.divf %105, %106 : vector<8x1xf32>
    %108 = vector.broadcast %100 : vector<8x1xf32> to vector<8x32xf32>
    %109 = arith.subf %96, %108 : vector<8x32xf32>
    %cst_62 = arith.constant 9.99999974E-6 : f32
    %110 = vector.broadcast %cst_62 : f32 to vector<8x1xf32>
    %111 = arith.addf %107, %110 : vector<8x1xf32>
    %112 = math.rsqrt %111 : vector<8x1xf32>
    %113 = vector.broadcast %112 : vector<8x1xf32> to vector<8x32xf32>
    %114 = arith.mulf %109, %113 : vector<8x32xf32>
    %115 = vector.broadcast %19 : vector<1x32xf32> to vector<8x32xf32>
    %116 = arith.mulf %114, %115 : vector<8x32xf32>
    %117 = vector.broadcast %21 : vector<1x32xf32> to vector<8x32xf32>
    %118 = arith.addf %116, %117 : vector<8x32xf32>
    %cst_63 = arith.constant dense<0.000000e+00> : vector<8x128xf32>
    %119 = tpu.matmul %118, %23, %cst_63 {dimension_numbers = #tpu.dot_dimension_numbers<[1], [0], [0], [1], [0, 0, 1, 1], [], []>} : vector<8x32xf32>, vector<32x128xf32>, vector<8x128xf32> -> vector<8x128xf32>
    %120 = vector.broadcast %25 : vector<1x128xf32> to vector<8x128xf32>
    %121 = arith.addf %119, %120 : vector<8x128xf32>
    %cst_64 = arith.constant 0.000000e+00 : f32
    %122 = vector.broadcast %cst_64 : f32 to vector<8x128xf32>
    %123 = arith.maximumf %121, %122 : vector<8x128xf32>
    %cst_65 = arith.constant dense<0.000000e+00> : vector<8x32xf32>
    %124 = tpu.matmul %123, %27, %cst_65 {dimension_numbers = #tpu.dot_dimension_numbers<[1], [0], [0], [1], [0, 0, 1, 1], [], []>} : vector<8x128xf32>, vector<128x32xf32>, vector<8x32xf32> -> vector<8x32xf32>
    %125 = vector.broadcast %29 : vector<1x32xf32> to vector<8x32xf32>
    %126 = arith.addf %124, %125 : vector<8x32xf32>
    %127 = arith.addf %118, %126 : vector<8x32xf32>
    %cst_66 = arith.constant dense<0.000000e+00> : vector<8xf32>
    %128 = vector.multi_reduction <add>, %127, %cst_66 [1] : vector<8x32xf32> to vector<8xf32>
    %129 = vector.shape_cast %128 : vector<8xf32> to vector<8x1xf32>
    %cst_67 = arith.constant 3.200000e+01 : f32
    %130 = vector.broadcast %cst_67 : f32 to vector<8x1xf32>
    %131 = arith.divf %129, %130 : vector<8x1xf32>
    %132 = vector.broadcast %131 : vector<8x1xf32> to vector<8x32xf32>
    %133 = arith.subf %127, %132 : vector<8x32xf32>
    %134 = arith.mulf %133, %133 : vector<8x32xf32>
    %cst_68 = arith.constant dense<0.000000e+00> : vector<8xf32>
    %135 = vector.multi_reduction <add>, %134, %cst_68 [1] : vector<8x32xf32> to vector<8xf32>
    %136 = vector.shape_cast %135 : vector<8xf32> to vector<8x1xf32>
    %cst_69 = arith.constant 3.200000e+01 : f32
    %137 = vector.broadcast %cst_69 : f32 to vector<8x1xf32>
    %138 = arith.divf %136, %137 : vector<8x1xf32>
    %139 = vector.broadcast %131 : vector<8x1xf32> to vector<8x32xf32>
    %140 = arith.subf %127, %139 : vector<8x32xf32>
    %cst_70 = arith.constant 9.99999974E-6 : f32
    %141 = vector.broadcast %cst_70 : f32 to vector<8x1xf32>
    %142 = arith.addf %138, %141 : vector<8x1xf32>
    %143 = math.rsqrt %142 : vector<8x1xf32>
    %144 = vector.broadcast %143 : vector<8x1xf32> to vector<8x32xf32>
    %145 = arith.mulf %140, %144 : vector<8x32xf32>
    %146 = vector.broadcast %31 : vector<1x32xf32> to vector<8x32xf32>
    %147 = arith.mulf %145, %146 : vector<8x32xf32>
    %148 = vector.broadcast %33 : vector<1x32xf32> to vector<8x32xf32>
    %149 = arith.addf %147, %148 : vector<8x32xf32>
    %c1 = arith.constant 1 : index
    %c0_71 = arith.constant 0 : index
    %c0_72 = arith.constant 0 : index
    %150 = vector.load %arg2[%c1, %c0_71, %c0_72] : memref<2x32x32xf32, #tpu.memory_space<vmem>>, vector<1x32x32xf32>
    %151 = vector.shape_cast %150 : vector<1x32x32xf32> to vector<32x32xf32>
    %c1_73 = arith.constant 1 : index
    %c0_74 = arith.constant 0 : index
    %c0_75 = arith.constant 0 : index
    %152 = vector.load %arg3[%c1_73, %c0_74, %c0_75] : memref<2x1x32xf32, #tpu.memory_space<vmem>>, vector<1x1x32xf32>
    %153 = vector.shape_cast %152 : vector<1x1x32xf32> to vector<1x32xf32>
    %c1_76 = arith.constant 1 : index
    %c0_77 = arith.constant 0 : index
    %c0_78 = arith.constant 0 : index
    %154 = vector.load %arg4[%c1_76, %c0_77, %c0_78] : memref<2x32x32xf32, #tpu.memory_space<vmem>>, vector<1x32x32xf32>
    %155 = vector.shape_cast %154 : vector<1x32x32xf32> to vector<32x32xf32>
    %c1_79 = arith.constant 1 : index
    %c0_80 = arith.constant 0 : index
    %c0_81 = arith.constant 0 : index
    %156 = vector.load %arg5[%c1_79, %c0_80, %c0_81] : memref<2x1x32xf32, #tpu.memory_space<vmem>>, vector<1x1x32xf32>
    %157 = vector.shape_cast %156 : vector<1x1x32xf32> to vector<1x32xf32>
    %c1_82 = arith.constant 1 : index
    %c0_83 = arith.constant 0 : index
    %c0_84 = arith.constant 0 : index
    %158 = vector.load %arg6[%c1_82, %c0_83, %c0_84] : memref<2x32x32xf32, #tpu.memory_space<vmem>>, vector<1x32x32xf32>
    %159 = vector.shape_cast %158 : vector<1x32x32xf32> to vector<32x32xf32>
    %c1_85 = arith.constant 1 : index
    %c0_86 = arith.constant 0 : index
    %c0_87 = arith.constant 0 : index
    %160 = vector.load %arg7[%c1_85, %c0_86, %c0_87] : memref<2x1x32xf32, #tpu.memory_space<vmem>>, vector<1x1x32xf32>
    %161 = vector.shape_cast %160 : vector<1x1x32xf32> to vector<1x32xf32>
    %c1_88 = arith.constant 1 : index
    %c0_89 = arith.constant 0 : index
    %c0_90 = arith.constant 0 : index
    %162 = vector.load %arg8[%c1_88, %c0_89, %c0_90] : memref<2x32x32xf32, #tpu.memory_space<vmem>>, vector<1x32x32xf32>
    %163 = vector.shape_cast %162 : vector<1x32x32xf32> to vector<32x32xf32>
    %c1_91 = arith.constant 1 : index
    %c0_92 = arith.constant 0 : index
    %c0_93 = arith.constant 0 : index
    %164 = vector.load %arg9[%c1_91, %c0_92, %c0_93] : memref<2x1x32xf32, #tpu.memory_space<vmem>>, vector<1x1x32xf32>
    %165 = vector.shape_cast %164 : vector<1x1x32xf32> to vector<1x32xf32>
    %c1_94 = arith.constant 1 : index
    %c0_95 = arith.constant 0 : index
    %c0_96 = arith.constant 0 : index
    %166 = vector.load %arg10[%c1_94, %c0_95, %c0_96] : memref<2x1x32xf32, #tpu.memory_space<vmem>>, vector<1x1x32xf32>
    %167 = vector.shape_cast %166 : vector<1x1x32xf32> to vector<1x32xf32>
    %c1_97 = arith.constant 1 : index
    %c0_98 = arith.constant 0 : index
    %c0_99 = arith.constant 0 : index
    %168 = vector.load %arg11[%c1_97, %c0_98, %c0_99] : memref<2x1x32xf32, #tpu.memory_space<vmem>>, vector<1x1x32xf32>
    %169 = vector.shape_cast %168 : vector<1x1x32xf32> to vector<1x32xf32>
    %c1_100 = arith.constant 1 : index
    %c0_101 = arith.constant 0 : index
    %c0_102 = arith.constant 0 : index
    %170 = vector.load %arg12[%c1_100, %c0_101, %c0_102] : memref<2x32x128xf32, #tpu.memory_space<vmem>>, vector<1x32x128xf32>
    %171 = vector.shape_cast %170 : vector<1x32x128xf32> to vector<32x128xf32>
    %c1_103 = arith.constant 1 : index
    %c0_104 = arith.constant 0 : index
    %c0_105 = arith.constant 0 : index
    %172 = vector.load %arg13[%c1_103, %c0_104, %c0_105] : memref<2x1x128xf32, #tpu.memory_space<vmem>>, vector<1x1x128xf32>
    %173 = vector.shape_cast %172 : vector<1x1x128xf32> to vector<1x128xf32>
    %c1_106 = arith.constant 1 : index
    %c0_107 = arith.constant 0 : index
    %c0_108 = arith.constant 0 : index
    %174 = vector.load %arg14[%c1_106, %c0_107, %c0_108] : memref<2x128x32xf32, #tpu.memory_space<vmem>>, vector<1x128x32xf32>
    %175 = vector.shape_cast %174 : vector<1x128x32xf32> to vector<128x32xf32>
    %c1_109 = arith.constant 1 : index
    %c0_110 = arith.constant 0 : index
    %c0_111 = arith.constant 0 : index
    %176 = vector.load %arg15[%c1_109, %c0_110, %c0_111] : memref<2x1x32xf32, #tpu.memory_space<vmem>>, vector<1x1x32xf32>
    %177 = vector.shape_cast %176 : vector<1x1x32xf32> to vector<1x32xf32>
    %c1_112 = arith.constant 1 : index
    %c0_113 = arith.constant 0 : index
    %c0_114 = arith.constant 0 : index
    %178 = vector.load %arg16[%c1_112, %c0_113, %c0_114] : memref<2x1x32xf32, #tpu.memory_space<vmem>>, vector<1x1x32xf32>
    %179 = vector.shape_cast %178 : vector<1x1x32xf32> to vector<1x32xf32>
    %c1_115 = arith.constant 1 : index
    %c0_116 = arith.constant 0 : index
    %c0_117 = arith.constant 0 : index
    %180 = vector.load %arg17[%c1_115, %c0_116, %c0_117] : memref<2x1x32xf32, #tpu.memory_space<vmem>>, vector<1x1x32xf32>
    %181 = vector.shape_cast %180 : vector<1x1x32xf32> to vector<1x32xf32>
    %cst_118 = arith.constant dense<0.000000e+00> : vector<8x32xf32>
    %182 = tpu.matmul %149, %151, %cst_118 {dimension_numbers = #tpu.dot_dimension_numbers<[1], [0], [0], [1], [0, 0, 1, 1], [], []>} : vector<8x32xf32>, vector<32x32xf32>, vector<8x32xf32> -> vector<8x32xf32>
    %183 = vector.broadcast %153 : vector<1x32xf32> to vector<8x32xf32>
    %184 = arith.addf %182, %183 : vector<8x32xf32>
    %cst_119 = arith.constant dense<0.000000e+00> : vector<8x32xf32>
    %185 = tpu.matmul %149, %155, %cst_119 {dimension_numbers = #tpu.dot_dimension_numbers<[1], [0], [0], [1], [0, 0, 1, 1], [], []>} : vector<8x32xf32>, vector<32x32xf32>, vector<8x32xf32> -> vector<8x32xf32>
    %186 = vector.broadcast %157 : vector<1x32xf32> to vector<8x32xf32>
    %187 = arith.addf %185, %186 : vector<8x32xf32>
    %cst_120 = arith.constant dense<0.000000e+00> : vector<8x32xf32>
    %188 = tpu.matmul %149, %159, %cst_120 {dimension_numbers = #tpu.dot_dimension_numbers<[1], [0], [0], [1], [0, 0, 1, 1], [], []>} : vector<8x32xf32>, vector<32x32xf32>, vector<8x32xf32> -> vector<8x32xf32>
    %189 = vector.broadcast %161 : vector<1x32xf32> to vector<8x32xf32>
    %190 = arith.addf %188, %189 : vector<8x32xf32>
    %191 = vector.extract_strided_slice %184 {offsets = [0, 0], sizes = [8, 8], strides = [1, 1]} : vector<8x32xf32> to vector<8x8xf32>
    %192 = vector.extract_strided_slice %184 {offsets = [0, 8], sizes = [8, 8], strides = [1, 1]} : vector<8x32xf32> to vector<8x8xf32>
    %193 = vector.extract_strided_slice %184 {offsets = [0, 16], sizes = [8, 8], strides = [1, 1]} : vector<8x32xf32> to vector<8x8xf32>
    %194 = vector.extract_strided_slice %184 {offsets = [0, 24], sizes = [8, 8], strides = [1, 1]} : vector<8x32xf32> to vector<8x8xf32>
    %195 = vector.shape_cast %191 : vector<8x8xf32> to vector<1x8x8xf32>
    %196 = vector.shape_cast %192 : vector<8x8xf32> to vector<1x8x8xf32>
    %197 = vector.shape_cast %193 : vector<8x8xf32> to vector<1x8x8xf32>
    %198 = vector.shape_cast %194 : vector<8x8xf32> to vector<1x8x8xf32>
    %199 = tpu.concatenate %195, %196, %197, %198 in 0 : vector<1x8x8xf32>, vector<1x8x8xf32>, vector<1x8x8xf32>, vector<1x8x8xf32> -> vector<4x8x8xf32>
    %200 = vector.extract_strided_slice %187 {offsets = [0, 0], sizes = [8, 8], strides = [1, 1]} : vector<8x32xf32> to vector<8x8xf32>
    %201 = vector.extract_strided_slice %187 {offsets = [0, 8], sizes = [8, 8], strides = [1, 1]} : vector<8x32xf32> to vector<8x8xf32>
    %202 = vector.extract_strided_slice %187 {offsets = [0, 16], sizes = [8, 8], strides = [1, 1]} : vector<8x32xf32> to vector<8x8xf32>
    %203 = vector.extract_strided_slice %187 {offsets = [0, 24], sizes = [8, 8], strides = [1, 1]} : vector<8x32xf32> to vector<8x8xf32>
    %204 = vector.shape_cast %200 : vector<8x8xf32> to vector<1x8x8xf32>
    %205 = vector.shape_cast %201 : vector<8x8xf32> to vector<1x8x8xf32>
    %206 = vector.shape_cast %202 : vector<8x8xf32> to vector<1x8x8xf32>
    %207 = vector.shape_cast %203 : vector<8x8xf32> to vector<1x8x8xf32>
    %208 = tpu.concatenate %204, %205, %206, %207 in 0 : vector<1x8x8xf32>, vector<1x8x8xf32>, vector<1x8x8xf32>, vector<1x8x8xf32> -> vector<4x8x8xf32>
    %209 = vector.extract_strided_slice %190 {offsets = [0, 0], sizes = [8, 8], strides = [1, 1]} : vector<8x32xf32> to vector<8x8xf32>
    %210 = vector.extract_strided_slice %190 {offsets = [0, 8], sizes = [8, 8], strides = [1, 1]} : vector<8x32xf32> to vector<8x8xf32>
    %211 = vector.extract_strided_slice %190 {offsets = [0, 16], sizes = [8, 8], strides = [1, 1]} : vector<8x32xf32> to vector<8x8xf32>
    %212 = vector.extract_strided_slice %190 {offsets = [0, 24], sizes = [8, 8], strides = [1, 1]} : vector<8x32xf32> to vector<8x8xf32>
    %213 = vector.shape_cast %209 : vector<8x8xf32> to vector<1x8x8xf32>
    %214 = vector.shape_cast %210 : vector<8x8xf32> to vector<1x8x8xf32>
    %215 = vector.shape_cast %211 : vector<8x8xf32> to vector<1x8x8xf32>
    %216 = vector.shape_cast %212 : vector<8x8xf32> to vector<1x8x8xf32>
    %217 = tpu.concatenate %213, %214, %215, %216 in 0 : vector<1x8x8xf32>, vector<1x8x8xf32>, vector<1x8x8xf32>, vector<1x8x8xf32> -> vector<4x8x8xf32>
    "tpu.trace_start"() <{level = 10 : i32, message = "hqd,hkd->hqk"}> : () -> ()
    %cst_121 = arith.constant dense<0.000000e+00> : vector<4x8x8xf32>
    %218 = tpu.matmul %199, %208, %cst_121 {dimension_numbers = #tpu.dot_dimension_numbers<[2], [2], [1], [1], [0, 0, 0, 1, 1, 1], [0], [0]>} : vector<4x8x8xf32>, vector<4x8x8xf32>, vector<4x8x8xf32> -> vector<4x8x8xf32>
    "tpu.trace_stop"() : () -> ()
    %cst_122 = arith.constant 0.353553385 : f32
    %219 = vector.broadcast %cst_122 : f32 to vector<4x8x8xf32>
    %220 = arith.mulf %218, %219 : vector<4x8x8xf32>
    %cst_123 = arith.constant dense<0xFF800000> : vector<4x8xf32>
    %221 = vector.multi_reduction <maximumf>, %220, %cst_123 [2] : vector<4x8x8xf32> to vector<4x8xf32>
    %222 = vector.shape_cast %221 : vector<4x8xf32> to vector<4x8x1xf32>
    %223 = vector.broadcast %222 : vector<4x8x1xf32> to vector<4x8x8xf32>
    %224 = arith.subf %220, %223 : vector<4x8x8xf32>
    %225 = math.exp %224 : vector<4x8x8xf32>
    %cst_124 = arith.constant dense<0.000000e+00> : vector<4x8xf32>
    %226 = vector.multi_reduction <add>, %225, %cst_124 [2] : vector<4x8x8xf32> to vector<4x8xf32>
    %227 = vector.shape_cast %226 : vector<4x8xf32> to vector<4x8x1xf32>
    %228 = tpu.reciprocal %227 {approx = true} : vector<4x8x1xf32> -> vector<4x8x1xf32>
    %229 = vector.broadcast %228 : vector<4x8x1xf32> to vector<4x8x8xf32>
    %230 = arith.mulf %225, %229 : vector<4x8x8xf32>
    "tpu.trace_start"() <{level = 10 : i32, message = "hqk,hkd->hqd"}> : () -> ()
    %cst_125 = arith.constant dense<0.000000e+00> : vector<4x8x8xf32>
    %231 = tpu.matmul %230, %217, %cst_125 {dimension_numbers = #tpu.dot_dimension_numbers<[2], [1], [1], [2], [0, 0, 0, 1, 1, 2], [0], [0]>} : vector<4x8x8xf32>, vector<4x8x8xf32>, vector<4x8x8xf32> -> vector<4x8x8xf32>
    "tpu.trace_stop"() : () -> ()
    %232 = vector.extract_strided_slice %231 {offsets = [0, 0, 0], sizes = [1, 8, 8], strides = [1, 1, 1]} : vector<4x8x8xf32> to vector<1x8x8xf32>
    %233 = vector.shape_cast %232 : vector<1x8x8xf32> to vector<8x8xf32>
    %234 = vector.extract_strided_slice %231 {offsets = [1, 0, 0], sizes = [1, 8, 8], strides = [1, 1, 1]} : vector<4x8x8xf32> to vector<1x8x8xf32>
    %235 = vector.shape_cast %234 : vector<1x8x8xf32> to vector<8x8xf32>
    %236 = vector.extract_strided_slice %231 {offsets = [2, 0, 0], sizes = [1, 8, 8], strides = [1, 1, 1]} : vector<4x8x8xf32> to vector<1x8x8xf32>
    %237 = vector.shape_cast %236 : vector<1x8x8xf32> to vector<8x8xf32>
    %238 = vector.extract_strided_slice %231 {offsets = [3, 0, 0], sizes = [1, 8, 8], strides = [1, 1, 1]} : vector<4x8x8xf32> to vector<1x8x8xf32>
    %239 = vector.shape_cast %238 : vector<1x8x8xf32> to vector<8x8xf32>
    %240 = tpu.concatenate %233, %235, %237, %239 in 1 : vector<8x8xf32>, vector<8x8xf32>, vector<8x8xf32>, vector<8x8xf32> -> vector<8x32xf32>
    %cst_126 = arith.constant dense<0.000000e+00> : vector<8x32xf32>
    %241 = tpu.matmul %240, %163, %cst_126 {dimension_numbers = #tpu.dot_dimension_numbers<[1], [0], [0], [1], [0, 0, 1, 1], [], []>} : vector<8x32xf32>, vector<32x32xf32>, vector<8x32xf32> -> vector<8x32xf32>
    %242 = vector.broadcast %165 : vector<1x32xf32> to vector<8x32xf32>
    %243 = arith.addf %241, %242 : vector<8x32xf32>
    %244 = arith.addf %149, %243 : vector<8x32xf32>
    %cst_127 = arith.constant dense<0.000000e+00> : vector<8xf32>
    %245 = vector.multi_reduction <add>, %244, %cst_127 [1] : vector<8x32xf32> to vector<8xf32>
    %246 = vector.shape_cast %245 : vector<8xf32> to vector<8x1xf32>
    %cst_128 = arith.constant 3.200000e+01 : f32
    %247 = vector.broadcast %cst_128 : f32 to vector<8x1xf32>
    %248 = arith.divf %246, %247 : vector<8x1xf32>
    %249 = vector.broadcast %248 : vector<8x1xf32> to vector<8x32xf32>
    %250 = arith.subf %244, %249 : vector<8x32xf32>
    %251 = arith.mulf %250, %250 : vector<8x32xf32>
    %cst_129 = arith.constant dense<0.000000e+00> : vector<8xf32>
    %252 = vector.multi_reduction <add>, %251, %cst_129 [1] : vector<8x32xf32> to vector<8xf32>
    %253 = vector.shape_cast %252 : vector<8xf32> to vector<8x1xf32>
    %cst_130 = arith.constant 3.200000e+01 : f32
    %254 = vector.broadcast %cst_130 : f32 to vector<8x1xf32>
    %255 = arith.divf %253, %254 : vector<8x1xf32>
    %256 = vector.broadcast %248 : vector<8x1xf32> to vector<8x32xf32>
    %257 = arith.subf %244, %256 : vector<8x32xf32>
    %cst_131 = arith.constant 9.99999974E-6 : f32
    %258 = vector.broadcast %cst_131 : f32 to vector<8x1xf32>
    %259 = arith.addf %255, %258 : vector<8x1xf32>
    %260 = math.rsqrt %259 : vector<8x1xf32>
    %261 = vector.broadcast %260 : vector<8x1xf32> to vector<8x32xf32>
    %262 = arith.mulf %257, %261 : vector<8x32xf32>
    %263 = vector.broadcast %167 : vector<1x32xf32> to vector<8x32xf32>
    %264 = arith.mulf %262, %263 : vector<8x32xf32>
    %265 = vector.broadcast %169 : vector<1x32xf32> to vector<8x32xf32>
    %266 = arith.addf %264, %265 : vector<8x32xf32>
    %cst_132 = arith.constant dense<0.000000e+00> : vector<8x128xf32>
    %267 = tpu.matmul %266, %171, %cst_132 {dimension_numbers = #tpu.dot_dimension_numbers<[1], [0], [0], [1], [0, 0, 1, 1], [], []>} : vector<8x32xf32>, vector<32x128xf32>, vector<8x128xf32> -> vector<8x128xf32>
    %268 = vector.broadcast %173 : vector<1x128xf32> to vector<8x128xf32>
    %269 = arith.addf %267, %268 : vector<8x128xf32>
    %cst_133 = arith.constant 0.000000e+00 : f32
    %270 = vector.broadcast %cst_133 : f32 to vector<8x128xf32>
    %271 = arith.maximumf %269, %270 : vector<8x128xf32>
    %cst_134 = arith.constant dense<0.000000e+00> : vector<8x32xf32>
    %272 = tpu.matmul %271, %175, %cst_134 {dimension_numbers = #tpu.dot_dimension_numbers<[1], [0], [0], [1], [0, 0, 1, 1], [], []>} : vector<8x128xf32>, vector<128x32xf32>, vector<8x32xf32> -> vector<8x32xf32>
    %273 = vector.broadcast %177 : vector<1x32xf32> to vector<8x32xf32>
    %274 = arith.addf %272, %273 : vector<8x32xf32>
    %275 = arith.addf %266, %274 : vector<8x32xf32>
    %cst_135 = arith.constant dense<0.000000e+00> : vector<8xf32>
    %276 = vector.multi_reduction <add>, %275, %cst_135 [1] : vector<8x32xf32> to vector<8xf32>
    %277 = vector.shape_cast %276 : vector<8xf32> to vector<8x1xf32>
    %cst_136 = arith.constant 3.200000e+01 : f32
    %278 = vector.broadcast %cst_136 : f32 to vector<8x1xf32>
    %279 = arith.divf %277, %278 : vector<8x1xf32>
    %280 = vector.broadcast %279 : vector<8x1xf32> to vector<8x32xf32>
    %281 = arith.subf %275, %280 : vector<8x32xf32>
    %282 = arith.mulf %281, %281 : vector<8x32xf32>
    %cst_137 = arith.constant dense<0.000000e+00> : vector<8xf32>
    %283 = vector.multi_reduction <add>, %282, %cst_137 [1] : vector<8x32xf32> to vector<8xf32>
    %284 = vector.shape_cast %283 : vector<8xf32> to vector<8x1xf32>
    %cst_138 = arith.constant 3.200000e+01 : f32
    %285 = vector.broadcast %cst_138 : f32 to vector<8x1xf32>
    %286 = arith.divf %284, %285 : vector<8x1xf32>
    %287 = vector.broadcast %279 : vector<8x1xf32> to vector<8x32xf32>
    %288 = arith.subf %275, %287 : vector<8x32xf32>
    %cst_139 = arith.constant 9.99999974E-6 : f32
    %289 = vector.broadcast %cst_139 : f32 to vector<8x1xf32>
    %290 = arith.addf %286, %289 : vector<8x1xf32>
    %291 = math.rsqrt %290 : vector<8x1xf32>
    %292 = vector.broadcast %291 : vector<8x1xf32> to vector<8x32xf32>
    %293 = arith.mulf %288, %292 : vector<8x32xf32>
    %294 = vector.broadcast %179 : vector<1x32xf32> to vector<8x32xf32>
    %295 = arith.mulf %293, %294 : vector<8x32xf32>
    %296 = vector.broadcast %181 : vector<1x32xf32> to vector<8x32xf32>
    %297 = arith.addf %295, %296 : vector<8x32xf32>
    %cst_140 = arith.constant dense<0.000000e+00> : vector<32xf32>
    %298 = vector.multi_reduction <add>, %297, %cst_140 [0] : vector<8x32xf32> to vector<32xf32>
    %299 = vector.shape_cast %298 : vector<32xf32> to vector<1x32xf32>
    %cst_141 = arith.constant 8.000000e+00 : f32
    %300 = vector.broadcast %cst_141 : f32 to vector<1x32xf32>
    %301 = arith.divf %299, %300 : vector<1x32xf32>
    %c0_142 = arith.constant 0 : index
    %c0_143 = arith.constant 0 : index
    %302 = vector.load %arg18[%c0_142, %c0_143] : memref<32x8xf32, #tpu.memory_space<vmem>>, vector<32x8xf32>
    %cst_144 = arith.constant dense<0.000000e+00> : vector<1x8xf32>
    %303 = tpu.matmul %301, %302, %cst_144 {dimension_numbers = #tpu.dot_dimension_numbers<[1], [0], [0], [1], [0, 0, 1, 1], [], []>} : vector<1x32xf32>, vector<32x8xf32>, vector<1x8xf32> -> vector<1x8xf32>
    %c0_145 = arith.constant 0 : index
    %c0_146 = arith.constant 0 : index
    %304 = vector.load %arg19[%c0_145, %c0_146] : memref<1x8xf32, #tpu.memory_space<vmem>>, vector<1x8xf32>
    %305 = arith.addf %303, %304 : vector<1x8xf32>
    %306 = arith.negf %305 : vector<1x8xf32>
    %307 = math.exp %306 : vector<1x8xf32>
    %cst_147 = arith.constant 1.000000e+00 : f32
    %308 = vector.broadcast %cst_147 : f32 to vector<1x8xf32>
    %309 = arith.addf %308, %307 : vector<1x8xf32>
    %310 = arith.divf %308, %309 : vector<1x8xf32>
    %c0_148 = arith.constant 0 : index
    %c0_149 = arith.constant 0 : index
    %c0_150 = arith.constant 0 : index
    %311 = vector.load %arg20[%c0_148, %c0_149, %c0_150] : memref<1x1x8xf32, #tpu.memory_space<vmem>>, vector<1x1x8xf32>
    %312 = vector.shape_cast %311 : vector<1x1x8xf32> to vector<1x8xf32>
    %313 = vector.shape_cast %310 : vector<1x8xf32> to vector<1x1x8xf32>
    tpu.vector_store %arg20[%c0_148, %c0_149, %c0_150], %313 {strides = array<i32>} : memref<1x1x8xf32, #tpu.memory_space<vmem>>, vector<1x1x8xf32>,
    return
  }
  func.func @transform_0(%arg0: i32) -> (i32, i32, i32) {
    %c0_i32 = arith.constant 0 : i32
    %c0_i32_0 = arith.constant 0 : i32
    %c0_i32_1 = arith.constant 0 : i32
    return %arg0, %c0_i32, %c0_i32_0 : i32, i32, i32
  }
  func.func @transform_1(%arg0: i32) -> (i32, i32, i32) {
    %c0_i32 = arith.constant 0 : i32
    %c0_i32_0 = arith.constant 0 : i32
    %c0_i32_1 = arith.constant 0 : i32
    %c0_i32_2 = arith.constant 0 : i32
    return %c0_i32, %c0_i32_0, %c0_i32_1 : i32, i32, i32
  }
  func.func @transform_2(%arg0: i32) -> (i32, i32, i32) {
    %c0_i32 = arith.constant 0 : i32
    %c0_i32_0 = arith.constant 0 : i32
    %c0_i32_1 = arith.constant 0 : i32
    %c0_i32_2 = arith.constant 0 : i32
    return %c0_i32, %c0_i32_0, %c0_i32_1 : i32, i32, i32
  }
  func.func @transform_3(%arg0: i32) -> (i32, i32, i32) {
    %c0_i32 = arith.constant 0 : i32
    %c0_i32_0 = arith.constant 0 : i32
    %c0_i32_1 = arith.constant 0 : i32
    %c0_i32_2 = arith.constant 0 : i32
    return %c0_i32, %c0_i32_0, %c0_i32_1 : i32, i32, i32
  }
  func.func @transform_4(%arg0: i32) -> (i32, i32, i32) {
    %c0_i32 = arith.constant 0 : i32
    %c0_i32_0 = arith.constant 0 : i32
    %c0_i32_1 = arith.constant 0 : i32
    %c0_i32_2 = arith.constant 0 : i32
    return %c0_i32, %c0_i32_0, %c0_i32_1 : i32, i32, i32
  }
  func.func @transform_5(%arg0: i32) -> (i32, i32, i32) {
    %c0_i32 = arith.constant 0 : i32
    %c0_i32_0 = arith.constant 0 : i32
    %c0_i32_1 = arith.constant 0 : i32
    %c0_i32_2 = arith.constant 0 : i32
    return %c0_i32, %c0_i32_0, %c0_i32_1 : i32, i32, i32
  }
  func.func @transform_6(%arg0: i32) -> (i32, i32, i32) {
    %c0_i32 = arith.constant 0 : i32
    %c0_i32_0 = arith.constant 0 : i32
    %c0_i32_1 = arith.constant 0 : i32
    %c0_i32_2 = arith.constant 0 : i32
    return %c0_i32, %c0_i32_0, %c0_i32_1 : i32, i32, i32
  }
  func.func @transform_7(%arg0: i32) -> (i32, i32, i32) {
    %c0_i32 = arith.constant 0 : i32
    %c0_i32_0 = arith.constant 0 : i32
    %c0_i32_1 = arith.constant 0 : i32
    %c0_i32_2 = arith.constant 0 : i32
    return %c0_i32, %c0_i32_0, %c0_i32_1 : i32, i32, i32
  }
  func.func @transform_8(%arg0: i32) -> (i32, i32, i32) {
    %c0_i32 = arith.constant 0 : i32
    %c0_i32_0 = arith.constant 0 : i32
    %c0_i32_1 = arith.constant 0 : i32
    %c0_i32_2 = arith.constant 0 : i32
    return %c0_i32, %c0_i32_0, %c0_i32_1 : i32, i32, i32
  }
  func.func @transform_9(%arg0: i32) -> (i32, i32, i32) {
    %c0_i32 = arith.constant 0 : i32
    %c0_i32_0 = arith.constant 0 : i32
    %c0_i32_1 = arith.constant 0 : i32
    %c0_i32_2 = arith.constant 0 : i32
    return %c0_i32, %c0_i32_0, %c0_i32_1 : i32, i32, i32
  }
  func.func @transform_10(%arg0: i32) -> (i32, i32, i32) {
    %c0_i32 = arith.constant 0 : i32
    %c0_i32_0 = arith.constant 0 : i32
    %c0_i32_1 = arith.constant 0 : i32
    %c0_i32_2 = arith.constant 0 : i32
    return %c0_i32, %c0_i32_0, %c0_i32_1 : i32, i32, i32
  }
  func.func @transform_11(%arg0: i32) -> (i32, i32, i32) {
    %c0_i32 = arith.constant 0 : i32
    %c0_i32_0 = arith.constant 0 : i32
    %c0_i32_1 = arith.constant 0 : i32
    %c0_i32_2 = arith.constant 0 : i32
    return %c0_i32, %c0_i32_0, %c0_i32_1 : i32, i32, i32
  }
  func.func @transform_12(%arg0: i32) -> (i32, i32, i32) {
    %c0_i32 = arith.constant 0 : i32
    %c0_i32_0 = arith.constant 0 : i32
    %c0_i32_1 = arith.constant 0 : i32
    %c0_i32_2 = arith.constant 0 : i32
    return %c0_i32, %c0_i32_0, %c0_i32_1 : i32, i32, i32
  }
  func.func @transform_13(%arg0: i32) -> (i32, i32, i32) {
    %c0_i32 = arith.constant 0 : i32
    %c0_i32_0 = arith.constant 0 : i32
    %c0_i32_1 = arith.constant 0 : i32
    %c0_i32_2 = arith.constant 0 : i32
    return %c0_i32, %c0_i32_0, %c0_i32_1 : i32, i32, i32
  }
  func.func @transform_14(%arg0: i32) -> (i32, i32, i32) {
    %c0_i32 = arith.constant 0 : i32
    %c0_i32_0 = arith.constant 0 : i32
    %c0_i32_1 = arith.constant 0 : i32
    %c0_i32_2 = arith.constant 0 : i32
    return %c0_i32, %c0_i32_0, %c0_i32_1 : i32, i32, i32
  }
  func.func @transform_15(%arg0: i32) -> (i32, i32, i32) {
    %c0_i32 = arith.constant 0 : i32
    %c0_i32_0 = arith.constant 0 : i32
    %c0_i32_1 = arith.constant 0 : i32
    %c0_i32_2 = arith.constant 0 : i32
    return %c0_i32, %c0_i32_0, %c0_i32_1 : i32, i32, i32
  }
  func.func @transform_16(%arg0: i32) -> (i32, i32, i32) {
    %c0_i32 = arith.constant 0 : i32
    %c0_i32_0 = arith.constant 0 : i32
    %c0_i32_1 = arith.constant 0 : i32
    %c0_i32_2 = arith.constant 0 : i32
    return %c0_i32, %c0_i32_0, %c0_i32_1 : i32, i32, i32
  }
  func.func @transform_17(%arg0: i32) -> (i32, i32) {
    %c0_i32 = arith.constant 0 : i32
    %c0_i32_0 = arith.constant 0 : i32
    %c0_i32_1 = arith.constant 0 : i32
    return %c0_i32, %c0_i32_0 : i32, i32
  }
  func.func @transform_18(%arg0: i32) -> (i32, i32) {
    %c0_i32 = arith.constant 0 : i32
    %c0_i32_0 = arith.constant 0 : i32
    %c0_i32_1 = arith.constant 0 : i32
    return %c0_i32, %c0_i32_0 : i32, i32
  }
  func.func @transform_19(%arg0: i32) -> (i32, i32, i32) {
    %c0_i32 = arith.constant 0 : i32
    %c0_i32_0 = arith.constant 0 : i32
    %c0_i32_1 = arith.constant 0 : i32
    return %arg0, %c0_i32, %c0_i32_0 : i32, i32, i32
  }
}

</mosaic_0001>

<bundles_post_ra>
// kernel: tpu_custom_call.1
= control target key start
LH: loop header
LB: loop body
LE: loop exit
PB: predicated region body
PF: predicated region fallthrough
CT: control target
= control target key end

     0   :  { %s4674_s0 = inlined_call_operand.vmem [shape: f32[2,8,32], index: 0, kind: input, shape index: {}]   ;;  %s4675_s1 = inlined_call_operand.vmem [shape: f32[2,32,32], index: 1, kind: input, shape index: {}]   ;;  %s4676_s2 = inlined_call_operand.vmem [shape: f32[2,1,32], index: 2, kind: input, shape index: {}]   ;;  %s4677_s3 = inlined_call_operand.vmem [shape: f32[2,32,32], index: 3, kind: input, shape index: {}]   ;;  %s4678_s4 = inlined_call_operand.vmem [shape: f32[2,1,32], index: 4, kind: input, shape index: {}]   ;;  %s4679_s5 = inlined_call_operand.vmem [shape: f32[2,32,32], index: 5, kind: input, shape index: {}]   ;;  %s4680_s6 = inlined_call_operand.vmem [shape: f32[2,1,32], index: 6, kind: input, shape index: {}]   ;;  %s4681_s7 = inlined_call_operand.vmem [shape: f32[2,32,32], index: 7, kind: input, shape index: {}]   ;;  %s4682_s8 = inlined_call_operand.vmem [shape: f32[2,1,32], index: 8, kind: input, shape index: {}]   ;;  %s4683_s9 = inlined_call_operand.vmem [shape: f32[2,1,32], index: 9, kind: input, shape index: {}]   ;;  %s4684_s10 = inlined_call_operand.vmem [shape: f32[2,1,32], index: 10, kind: input, shape index: {}]   ;;  %s4685_s11 = inlined_call_operand.vmem [shape: f32[2,32,128], index: 11, kind: input, shape index: {}]   ;;  %s4686_s12 = inlined_call_operand.vmem [shape: f32[2,1,128], index: 12, kind: input, shape index: {}]   ;;  %s4687_s13 = inlined_call_operand.vmem [shape: f32[2,128,32], index: 13, kind: input, shape index: {}]   ;;  %s4688_s14 = inlined_call_operand.vmem [shape: f32[2,1,32], index: 14, kind: input, shape index: {}]   ;;  %s4689_s15 = inlined_call_operand.vmem [shape: f32[2,1,32], index: 15, kind: input, shape index: {}]   ;;  %s4690_s16 = inlined_call_operand.vmem [shape: f32[2,1,32], index: 16, kind: input, shape index: {}]   ;;  %s4691_s17 = inlined_call_operand.vmem [shape: f32[32,8], index: 17, kind: input, shape index: {}]   ;;  %s4692_s18 = inlined_call_operand.vmem [shape: f32[1,8], index: 18, kind: input, shape index: {}]   ;;  %s4693_s19 = inlined_call_operand.hbm [shape: f32[2,1,8], index: 19, kind: output, shape index: {}]  }
   0x1   :  { %4709 = sst [smem:[#allocation11_spill]] %s4674_s0 }
   0x2   :  { %4710 = sst [smem:[#allocation12_spill]] %s4675_s1 }
   0x3   :  { %4711 = sst [smem:[#allocation13_spill]] %s4676_s2 }
   0x4   :  { %4712 = sst [smem:[#allocation14_spill]] %s4677_s3 }
   0x5   :  { %4713 = sst [smem:[#allocation15_spill]] %s4678_s4 }
   0x6   :  { %4714 = sst [smem:[#allocation16_spill]] %s4679_s5 }
   0x7   :  { %4715 = sst [smem:[#allocation17_spill]] %s4680_s6 }
   0x8   :  { %4716 = sst [smem:[#allocation18_spill]] %s4693_s19 }
   0x9   :  { %24 = vsyncpa [#allocation3], 0 }
   0xa   :  { %26 = vsyncpa [#allocation3 + $0x1], 0  ;;  %s4032_s0 = smov 0   ;;  %s4034_s30 = smov 0  }
   0xb   :  { %s4036_s20 = smov 0   ;;  %s4038_s21 = smov 0  }
   0xc LB: > { %4717 = sst [smem:[#allocation5_spill]] %s3909_s0  ;;  %s4053_s1 = sadd.s32 4294967295, %s3921_s21   ;;  %s3921_s21 = sphi %s4038_s21, %s4741_s21   ;;  %s3917_s20 = sphi %s4036_s20, %s4743_s20   ;;  %s3913_s30 = sphi %s4034_s30, %s4745_s30   ;;  %s3909_s0 = sphi %s4032_s0, %s4744_s0  }
   0xd   : > { %4718 = sst [smem:[#allocation6_spill]] %s3917_s20  ;;  %s3268_s22 = sadd.s32 4294967294, %s3921_s21  }
   0xe   : > { %4719 = sst [smem:[#allocation7_spill]] %s3921_s21  ;;  %s4057_s2 = sadd.s32 1, %s3921_s21  }
   0xf   : > { %4720 = sst [smem:[#allocation8_spill]] %s4057_s2  ;;  %s443_s23 = sadd.s32 1, %s3917_s20 }
  0x10   : > { %s440_s24 = ssub.s32 %s3921_s21, %s4057_s2  ;;  %p453_p0 = scmp.ne.s32.totalorder %s3917_s20, %s3913_s30 }
  0x11   : > { %p441_p1 = scmp.eq.s32.totalorder %s440_s24, 0  ;;  %p454_p2 = scmp.eq.s32.totalorder %s4053_s1, 1 }
  0x12   : > { %p459_p3 = scmp.ne.s32.totalorder %s3913_s30, %s3909_s0  ;;  %p460_p4 = scmp.eq.s32.totalorder %s3268_s22, 1 }
  0x13   : > { %s4068_s25 = scalar_select %p441_p1, %s3917_s20, %s443_s23  }
  0x14   : > { %p4070_p5 = por %p454_p2, %p453_p0  ;;  %p4074_p6 = por %p460_p4, %p459_p3 }
  0x15   : > { %4721 = sst [smem:[#allocation9_spill]] %s4068_s25  ;;  %p3271_p7 = scmp.ge.s32.totalorder %s3921_s21, 1 }
  0x16   : > { %s4723_s26 = scalar_select %p4074_p6, 1, 0 }
  0x17   : > { %p539_p8 = scmp.lt.s32.totalorder %s3921_s21, 3 }
  0x18   : > { %4724 = sst [smem:[#allocation10_spill]] %s4723_s26 }
  0x19   : > { %p540_p9 = pnand %p3271_p7, %p539_p8 }
  0x1a   : > { %s4725_s29 = sld [smem:[#allocation12_spill]] (!%p540_p9)  ;;  %p593_p10 = scmp.lt.s32.totalorder (!%p540_p9), %s4053_s1, 1 }
  0x1b   : > { %543 = sbr.rel (%p540_p9) target bundleno = 5003 (0x138b), region = 96  ;;  %s4726_s26 = sld [smem:[#allocation11_spill]] (!%p540_p9) }
  0x1c   : > { %s4727_s21 = sld [smem:[#allocation14_spill]] (!%p540_p9)  ;;  %s3925_s25 = smov (!%p540_p9), 112  }
  0x1d   : > { %s4729_s4 = sld [smem:[#allocation15_spill]] (!%p540_p9)  ;;  %s4704_s23 = smov (!%p540_p9), 24  }
  0x1e   : > { %s4730_s28 = sld [smem:[#allocation13_spill]] (!%p540_p9)  ;;  %s4734_s2 = smov (!%p540_p9), 8  }
  0x1f   : > { %s4731_s5 = sld [smem:[#allocation16_spill]] (!%p540_p9)  ;;  %s4735_s27 = smov (!%p540_p9), 16  }
  0x20   : > { %v601_v0 = vld [vmem:[%s4725_s29 + $0x18] sm:$0xff]  ;;  %v3923_v1 = vmov 0.0   ;;  %v600_v2 = vld [vmem:[%s4725_s29 + $0x10] sm:$0xff]  ;;  %vm3924_vm0 = vmmov 0   ;;  %s594_s24 = scalar_select %p593_p10, %s4053_s1, 1  ;;  %v599_v3 = vld [vmem:[%s4725_s29 + $0x8] sm:$0xff] }
  0x21   : > { %3499 = vmatprep.subr.mxu1 %v3923_v1  ;;  %3507 = vmatprep.mubr.msk.f32.mxu1 %vm3924_vm0, %v3923_v1  ;;  %v598_v4 = vld [vmem:[%s4725_s29] sm:$0xff]  ;;  %vm650_vm1 = vcmask 261120   ;;  %vm900_vm2 = vcmask 64512   ;;  %s4732_s6 = sld [smem:[#allocation17_spill]]  ;;  %vm1550_vm3 = vcmask 130048   ;;  %vm1552_vm4 = vcmask 195584  }
  0x22   : > { %3500 = vmatpush3.msra.mxu1 %v601_v0  ;;  %3521 = vmatprep.subr.mxu0 %v3923_v1  ;;  %s3272_s22 = sshll.u32 %s594_s24, 3  ;;  %s4728_s19 = smov %s4727_s21  ;;  %v606_v6 = vld [vmem:[%s4727_s21 + $0x18] sm:$0xff]  ;;  %vm3198_vm5 = vcmask 57344  }
  0x23   : > { %3501 = vmatprep.subr.mxu1 %v3923_v1  ;;  %3529 = vmatprep.mubr.msk.f32.mxu0 %vm3924_vm0, %v3923_v1  ;;  %s596_s0 = scalar_lea.vmem %s4726_s26, %s3272_s22  ;;  %v605_v7 = vld [vmem:[%s4728_s19 + $0x10] sm:$0xff]  ;;  %v604_v8 = vld [vmem:[%s4728_s19 + $0x8] sm:$0xff]  ;;  %v603_v9 = vld [vmem:[%s4728_s19] sm:$0xff]  ;;  %s3926_s24 = smov 120  }
  0x24   : > { %3502 = vmatpush3.msra.mxu1 %v600_v2  ;;  %v4105_v5 = vld [vmem:[%s596_s0] sm:$0xff]  ;;  %s4707_s0 = smov 104   ;;  %s4706_s26 = smov 8  }
  0x25   : > { %3503 = vmatprep.subr.mxu1 %v3923_v1  ;;  %v3275_v12 = vld [vmem:[%s4729_s4] ss:$0 sm:$0xff]  ;;  %v611_v17 = vld [vmem:[%s4731_s5 + $0x18] sm:$0xff]  ;;  %v610_v18 = vld [vmem:[%s4731_s5 + $0x10] sm:$0xff]  ;;  %s4705_s22 = smov 16   ;;  %s4733_s21 = smov 104  }
  0x26   : > { %3504 = vmatpush3.msra.mxu1 %v599_v3  ;;  %v3273_v15 = vld [vmem:[%s4730_s28] ss:$0 sm:$0xff]  ;;  %3522 = vmatpush3.msra.mxu0 %v611_v17  ;;  %v609_v20 = vld [vmem:[%s4731_s5 + $0x8] sm:$0xff] }
  0x27   : > { %3505 = vmatprep.subr.mxu1 %v3923_v1  ;;  %3523 = vmatprep.subr.mxu0 %v3923_v1  ;;  %v608_v21 = vld [vmem:[%s4731_s5] sm:$0xff] }
  0x28   : > { %3506 = vmatpush3.msra.mxu1 %v598_v4  ;;  %3524 = vmatpush3.msra.mxu0 %v610_v18  ;;  %v3277_v32 = vld [vmem:[%s4732_s6] ss:$0 sm:$0xff] }
  0x29   : > { %3508 = vmatmul.mubr.msk.f32.vlgmr.msra.gmra.mxu1 %vm650_vm1, %v4105_v5  ;;  %3510 = vmatprep.subr.mxu1 %v3923_v1 }
  0x2a   : > { %3511 = vmatpush3.msra.mxu1 %v606_v6  ;;  %3518 = vmatprep.mubr.msk.f32.mxu1 %vm3924_vm0, %v3923_v1 }
  0x2b   : > { %3512 = vmatprep.subr.mxu1 %v3923_v1  ;;  %3525 = vmatprep.subr.mxu0 %v3923_v1 }
  0x2c   : > { %3513 = vmatpush3.msra.mxu1 %v605_v7  ;;  %3526 = vmatpush3.msra.mxu0 %v609_v20 }
  0x2d   : > { %3514 = vmatprep.subr.mxu1 %v3923_v1  ;;  %3527 = vmatprep.subr.mxu0 %v3923_v1 }
  0x2e   : > { %3515 = vmatpush3.msra.mxu1 %v604_v8  ;;  %3528 = vmatpush3.msra.mxu0 %v608_v21 }
  0x2f   : > { %3516 = vmatprep.subr.mxu1 %v3923_v1  ;;  %3530 = vmatmul.mubr.msk.f32.vlgmr.msra.gmra.mxu0 %vm650_vm1, %v4105_v5 }
  0x30   : > { %3517 = vmatpush3.msra.mxu1 %v603_v9  ;;  %3552 = vmatprep.subr.mxu0 %v3923_v1 }
  0x31   : > { %3519 = vmatmul.mubr.msk.f32.vlgmr.msra.gmra.mxu1 %vm650_vm1, %v4105_v5  ;;  %3532 = vmatprep.subr.mxu1 %v3923_v1 }
  0x32   : > { %3534 = vmatprep.mubr.msk.f32.mxu1 %vm3924_vm0, %v3923_v1  ;;  %3554 = vmatprep.mubr.msk.f32.mxu0 %vm3924_vm0, %v3923_v1 }
  0xe9   : > { %v720_v10 = vpop.f32.mrf.mxu1 }
  0xea   : > { %v721_v19 = vadd.f32 %v3273_v15, %v720_v10 }
  0xeb   : > { %v3509_v11 = vpop.f32.mrf.mxu1 }
  0xef   : > { %v872_v33 = vpop.f32.mrf.mxu0 }
  0xf0   : > { %v873_v34 = vadd.f32 %v3277_v32, %v872_v33 }
  0xf1   : > { %v796_v13 = vpop.f32.mrf.mxu1  ;;  %v3531_v35 = vpop.f32.mrf.mxu0 }
  0xf2   : > { %v797_v14 = vadd.f32 %v3275_v12, %v796_v13  ;;  %3553 = vmatpush3.msra.mxu0 %v873_v34 }
  0xf3   : > { %v3520_v16 = vpop.f32.mrf.mxu1  ;;  %3562 = vmatprep.subr.mxu0 %v3923_v1 }
  0xf4   : > { %886 = vrot.lane.b32.xlu1 %v797_v14, %s3925_s25  ;;  %884 = vrot.lane.b32.xlu0 %v797_v14, %s3926_s24 }
  0xf5   : > { %3533 = vmatpush3.xpose.msk.msra.mxu1 %vm900_vm2, %v797_v14 }
  0xf6   : > { %3537 = vmatprep.subr.mxu1 %v3923_v1 }
  0xf8   : > { %3535 = vmatmul.mubr.msk.f32.vlgmr.msra.gmra.mxu1 %vm900_vm2, %v721_v19  ;;  %879 = vrot.lane.b32.xlu1 %v721_v19, %s3925_s25 }
  0xf9   : > { %877 = vrot.lane.b32.xlu0 %v721_v19, %s3926_s24  ;;  %3539 = vmatprep.mubr.msk.f32.mxu1 %vm3924_vm0, %v3923_v1 }
  0xfc   : > { %881 = vrot.lane.b32.xlu1 %v721_v19, %s4707_s0 }
  0xfd   : > { %888 = vrot.lane.b32.xlu0 %v797_v14, %s4707_s0 }
 0x166   : > { %v885_v22 = vpop.permute.xlu0 %884  ;;  %v887_v23 = vpop.permute.xlu1 %886 }
 0x167   : > { %3538 = vmatpush3.xpose.msk.msra.mxu1 %vm900_vm2, %v885_v22 }
 0x168   : > { %3542 = vmatprep.subr.mxu1 %v3923_v1 }
 0x16a   : > { %v880_v25 = vpop.permute.xlu1 %879 }
 0x16b   : > { %v878_v24 = vpop.permute.xlu0 %877 }
 0x16c   : > { %3540 = vmatmul.mubr.msk.f32.vlgmr.msra.gmra.mxu1 %vm900_vm2, %v878_v24  ;;  %v615_v24 = vld [vmem:[%s4681_s7 + $0x10] sm:$0xff] }
 0x16d   : > { %3543 = vmatpush3.xpose.msk.msra.mxu1 %vm900_vm2, %v887_v23  ;;  %3544 = vmatprep.mubr.msk.f32.mxu1 %vm3924_vm0, %v3923_v1  ;;  %v616_v23 = vld [vmem:[%s4681_s7 + $0x18] sm:$0xff] }
 0x16e   : > { %3547 = vmatprep.subr.mxu1 %v3923_v1  ;;  %v882_v27 = vpop.permute.xlu1 %881 }
 0x16f   : > { %v889_v26 = vpop.permute.xlu0 %888 }
 0x170   : > { %3545 = vmatmul.mubr.msk.f32.vlgmr.msra.gmra.mxu1 %vm900_vm2, %v880_v25  ;;  %v614_v25 = vld [vmem:[%s4681_s7 + $0x8] sm:$0xff] }
 0x171   : > { %3548 = vmatpush3.xpose.msk.msra.mxu1 %vm900_vm2, %v889_v26  ;;  %3549 = vmatprep.mubr.msk.f32.mxu1 %vm3924_vm0, %v3923_v1  ;;  %v613_v26 = vld [vmem:[%s4681_s7] sm:$0xff] }
 0x172   : > { %3557 = vmatprep.subr.mxu1 %v3923_v1 }
 0x174   : > { %3550 = vmatmul.mubr.msk.f32.vlgmr.msra.gmra.mxu1 %vm900_vm2, %v882_v27 }
 0x175   : > { %3559 = vmatprep.mubr.msk.f32.mxu1 %vm3924_vm0, %v3923_v1 }
 0x1b8   : > { %v971_v28 = vpop.f32.mrf.mxu1 }
 0x1b9   : > { %v1197_v29 = vmul.f32 0.35355338, %v971_v28 }
 0x1ba   : > { %v3536_v30 = vpop.f32.mrf.mxu1 }
 0x1bb   : > { %v1201_v31 = vsel %vm900_vm2, %v1197_v29, -inf }
 0x1bc   : > { %1202 = vmax.xlane.f32.xlu0 %v1201_v31 }
 0x22c   : > { %v1045_v36 = vpop.f32.mrf.mxu1 }
 0x22d   : > { %v1198_v37 = vmul.f32 0.35355338, %v1045_v36 }
 0x22e   : > { %v3541_v38 = vpop.f32.mrf.mxu1 }
 0x22f   : > { %v1204_v39 = vsel %vm900_vm2, %v1198_v37, -inf }
 0x230   : > { %1205 = vmax.xlane.f32.xlu1 %v1204_v39  ;;  %v1119_v40 = vpop.f32.mrf.mxu1  ;;  %v3291_v39 = vld [vmem:[%s4682_s8] ss:$0 sm:$0xff] }
 0x231   : > { %v1199_v41 = vmul.f32 0.35355338, %v1119_v40 }
 0x232   : > { %v3546_v42 = vpop.f32.mrf.mxu1 }
 0x233   : > { %v1207_v43 = vsel %vm900_vm2, %v1199_v41, -inf }
 0x234   : > { %1208 = vmax.xlane.f32.xlu0 %v1207_v43  ;;  %v1193_v44 = vpop.f32.mrf.mxu1 }
 0x235   : > { %v1200_v45 = vmul.f32 0.35355338, %v1193_v44 }
 0x236   : > { %v3551_v46 = vpop.f32.mrf.mxu1 }
 0x237   : > { %v1210_v47 = vsel %vm900_vm2, %v1200_v45, -inf }
 0x238   : > { %1211 = vmax.xlane.f32.xlu0 %v1210_v47 }
 0x241   : > { %891 = vrot.lane.b32.xlu1 %v873_v34, %s3926_s24 }
 0x245   : > { %v1203_v48 = vpop.xlane.xlu0 %1202 }
 0x246   : > { %v1213_v49 = vsub.f32 %v1197_v29, %v1203_v48 }
 0x248   : > { %v1217_v50 = vmul.f32 1.442695, %v1213_v49 }
 0x24a   : > { %3817 = vpow2.f32 %v1217_v50  ;;  %v623_v50 = vld [vmem:[%s4685_s11 + $0x18] sm:$0xff] }
 0x257   : > { %v3818_v51 = vpop.eup %3817 }
 0x258   : > { %v1225_v52 = vsel %vm900_vm2, %v3818_v51, 0.0 }
 0x265   : > { %1226 = vadd.xlane.f32.xlu1 %v1225_v52  ;;  %v620_v52 = vld [vmem:[%s4685_s11] sm:$0xff] }
 0x2b9   : > { %v1206_v53 = vpop.xlane.xlu1 %1205 }
 0x2ba   : > { %v1214_v54 = vsub.f32 %v1198_v37, %v1206_v53  ;;  %v640_v53 = vld [vmem:[%s4687_s13 + $0x78] sm:$0xff] }
 0x2bc   : > { %v1219_v55 = vmul.f32 1.442695, %v1214_v54  ;;  %v639_v54 = vld [vmem:[%s4687_s13 + $0x70] sm:$0xff] }
 0x2bd   : > { %v1209_v56 = vpop.xlane.xlu0 %1208  ;;  %v892_v57 = vpop.permute.xlu1 %891 }
 0x2be   : > { %3819 = vpow2.f32 %v1219_v55  ;;  %v1215_v58 = vsub.f32 %v1199_v41, %v1209_v56  ;;  %3558 = vmatpush3.msra.mxu1 %v892_v57  ;;  %v638_v55 = vld [vmem:[%s4687_s13 + $0x68] sm:$0xff]  ;;  %v637_v56 = vld [vmem:[%s4687_s13 + $0x60] sm:$0xff]  ;;  %v636_v57 = vld [vmem:[%s4687_s13 + $0x58] sm:$0xff] }
 0x2bf   : > { %3567 = vmatprep.subr.mxu1 %v3923_v1 }
 0x2c0   : > { %v1221_v59 = vmul.f32 1.442695, %v1215_v58  ;;  %v635_v58 = vld [vmem:[%s4687_s13 + $0x50] sm:$0xff] }
 0x2c1   : > { %v1212_v60 = vpop.xlane.xlu0 %1211 }
 0x2c2   : > { %3821 = vpow2.f32 %v1221_v59  ;;  %v1216_v61 = vsub.f32 %v1200_v45, %v1212_v60  ;;  %v634_v59 = vld [vmem:[%s4687_s13 + $0x48] sm:$0xff]  ;;  %v633_v60 = vld [vmem:[%s4687_s13 + $0x40] sm:$0xff] }
 0x2c4   : > { %v1223_v62 = vmul.f32 1.442695, %v1216_v61  ;;  %v632_v61 = vld [vmem:[%s4687_s13 + $0x38] sm:$0xff] }
 0x2c6   : > { %3823 = vpow2.f32 %v1223_v62  ;;  %v631_v62 = vld [vmem:[%s4687_s13 + $0x30] sm:$0xff] }
 0x2cb   : > { %v3820_v63 = vpop.eup %3819 }
 0x2cc   : > { %v1228_v0 = vsel %vm900_vm2, %v3820_v63, 0.0 }
 0x2cd   : > { %1229 = vadd.xlane.f32.xlu0 %v1228_v0  ;;  %v629_v0 = vld [vmem:[%s4687_s13 + $0x20] sm:$0xff] }
 0x2cf   : > { %v3822_v2 = vpop.eup %3821 }
 0x2d0   : > { %v1231_v3 = vsel %vm900_vm2, %v3822_v2, 0.0 }
 0x2d1   : > { %1232 = vadd.xlane.f32.xlu1 %v1231_v3 }
 0x2d3   : > { %v3824_v4 = vpop.eup %3823 }
 0x2d4   : > { %v1234_v6 = vsel %vm900_vm2, %v3824_v4, 0.0 }
 0x2d5   : > { %1235 = vadd.xlane.f32.xlu0 %v1234_v6 }
 0x2e2   : > { %897 = vrot.lane.b32.xlu1 %v873_v34, %s4707_s0 }
 0x2eb   : > { %894 = vrot.lane.b32.xlu0 %v873_v34, %s3925_s25 }
 0x2ee   : > { %v1227_v7 = vpop.xlane.xlu1 %1226 }
 0x2ef   : > { %3825 = vrcp.f32 %v1227_v7 }
 0x2fc   : > { %v3826_v8 = vpop.eup %3825 }
 0x2fd   : > { %v1241_v9 = vmul.f32 %v3826_v8, %v3818_v51  ;;  %v622_v51 = vld [vmem:[%s4685_s11 + $0x10] sm:$0xff]  ;;  %v3293_v8 = vld [vmem:[%s4683_s9] ss:$0 sm:$0xff] }
 0x2ff   : > { %3555 = vmatmul.mubr.msk.f32.vlgmr.msra.gmra.mxu0 %vm900_vm2, %v1241_v9 }
 0x300   : > { %3564 = vmatprep.mubr.msk.f32.mxu0 %vm3924_vm0, %v3923_v1 }
 0x356   : > { %v1230_v10 = vpop.xlane.xlu0 %1229 }
 0x357   : > { %3827 = vrcp.f32 %v1230_v10  ;;  %v3294_v10 = vld [vmem:[%s4684_s10] ss:$0 sm:$0xff] }
 0x35a   : > { %v1233_v11 = vpop.xlane.xlu1 %1232 }
 0x35b   : > { %3829 = vrcp.f32 %v1233_v11 }
 0x35e   : > { %v1236_v12 = vpop.xlane.xlu0 %1235  ;;  %v898_v16 = vpop.permute.xlu1 %897 }
 0x35f   : > { %3831 = vrcp.f32 %v1236_v12 }
 0x362   : > { %v895_v13 = vpop.permute.xlu0 %894 }
 0x363   : > { %3563 = vmatpush3.msra.mxu0 %v895_v13  ;;  %v627_v13 = vld [vmem:[%s4687_s13 + $0x10] sm:$0xff] }
 0x364   : > { %v3828_v14 = vpop.eup %3827  ;;  %3572 = vmatprep.subr.mxu0 %v3923_v1 }
 0x365   : > { %v1242_v15 = vmul.f32 %v3828_v14, %v3820_v63  ;;  %v630_v63 = vld [vmem:[%s4687_s13 + $0x28] sm:$0xff] }
 0x366   : > { %v626_v14 = vld [vmem:[%s4687_s13 + $0x8] sm:$0xff] }
 0x367   : > { %3560 = vmatmul.mubr.msk.f32.vlgmr.msra.gmra.mxu1 %vm900_vm2, %v1242_v15  ;;  %v625_v15 = vld [vmem:[%s4687_s13] sm:$0xff] }
 0x368   : > { %v3830_v17 = vpop.eup %3829  ;;  %3568 = vmatpush3.msra.mxu1 %v898_v16  ;;  %3569 = vmatprep.mubr.msk.f32.mxu1 %vm3924_vm0, %v3923_v1  ;;  %v3295_v16 = vld [vmem:[%s4686_s12] ss:$0 sm:$0xff] }
 0x369   : > { %v1243_v18 = vmul.f32 %v3830_v17, %v3822_v2  ;;  %3583 = vmatprep.subr.mxu1 %v3923_v1  ;;  %v628_v2 = vld [vmem:[%s4687_s13 + $0x18] sm:$0xff] }
 0x36b   : > { %3565 = vmatmul.mubr.msk.f32.vlgmr.msra.gmra.mxu0 %vm900_vm2, %v1243_v18 }
 0x36c   : > { %v3832_v19 = vpop.eup %3831  ;;  %3580 = vmatprep.mubr.msk.f32.mxu0 %vm3924_vm0, %v3923_v1  ;;  %3573 = vmatpush3.msra.mxu0 %v616_v23 }
 0x36d   : > { %v1244_v20 = vmul.f32 %v3832_v19, %v3824_v4  ;;  %3574 = vmatprep.subr.mxu0 %v3923_v1 }
 0x36e   : > { %3575 = vmatpush3.msra.mxu0 %v615_v24 }
 0x36f   : > { %3570 = vmatmul.mubr.msk.f32.vlgmr.msra.gmra.mxu1 %vm900_vm2, %v1244_v20  ;;  %3576 = vmatprep.subr.mxu0 %v3923_v1 }
 0x370   : > { %3591 = vmatprep.mubr.msk.f32.mxu1 %vm3924_vm0, %v3923_v1  ;;  %3577 = vmatpush3.msra.mxu0 %v614_v25 }
 0x371   : > { %3578 = vmatprep.subr.mxu0 %v3923_v1  ;;  %3584 = vmatpush3.msra.mxu1 %v623_v50  ;;  %v3312_v50 = vld [vmem:[%s4731_s5 + $0x30] sm:$0xff] }
 0x372   : > { %3579 = vmatpush3.msra.mxu0 %v613_v26  ;;  %3585 = vmatprep.subr.mxu1 %v3923_v1 }
 0x373   : > { %3594 = vmatprep.subr.mxu0 %v3923_v1  ;;  %3586 = vmatpush3.msra.mxu1 %v622_v51  ;;  %v3311_v51 = vld [vmem:[%s4731_s5 + $0x28] sm:$0xff] }
 0x374   : > { %3587 = vmatprep.subr.mxu1 %v3923_v1 }
 0x3bf   : > { %v1314_v21 = vpop.f32.mrf.mxu0 }
 0x3c1   : > { %v3556_v22 = vpop.f32.mrf.mxu0 }
 0x427   : > { %v1387_v27 = vpop.f32.mrf.mxu1 }
 0x428   : > { %1538 = vrot.lane.b32.xlu1 %v1387_v27, %s4706_s26  ;;  %s591_s26 = sand.u32 1, %s3913_s30  }
 0x429   : > { %v3561_v28 = vpop.f32.mrf.mxu1 }
 0x42b   : > { %v1460_v29 = vpop.f32.mrf.mxu0 }
 0x42c   : > { %1542 = vrot.lane.b32.xlu0 %v1460_v29, %s4705_s22  ;;  %s3201_s22 = scalar_lea.sflag [#allocation3], %s591_s26 }
 0x42d   : > { %v3566_v30 = vpop.f32.mrf.mxu0 }
 0x42f   : > { %v1533_v31 = vpop.f32.mrf.mxu1 }
 0x430   : > { %1546 = vrot.lane.b32.xlu1 %v1533_v31, %s4704_s23  ;;  %s3375_s23 = sshll.u32 %s4053_s1, 4 }
 0x431   : > { %v3571_v32 = vpop.f32.mrf.mxu1 }
 0x432   : > { %v3303_v32 = vld [vmem:[%s4725_s29 + $0x38] sm:$0xff] }
 0x49a   : > { %v1539_v33 = vpop.permute.xlu1 %1538 }
 0x49b   : > { %v1549_v35 = vsel %vm900_vm2, %v1314_v21, %v1539_v33  ;;  %v3297_v21 = vld [vmem:[%s4688_s14] ss:$0 sm:$0xff]  ;;  %v3302_v33 = vld [vmem:[%s4725_s29 + $0x30] sm:$0xff] }
 0x49e   : > { %v1543_v34 = vpop.permute.xlu0 %1542 }
 0x49f   : > { %v1551_v36 = vsel %vm1550_vm3, %v1549_v35, %v1543_v34  ;;  %v3301_v34 = vld [vmem:[%s4725_s29 + $0x28] sm:$0xff]  ;;  %v3300_v35 = vld [vmem:[%s4725_s29 + $0x20] sm:$0xff] }
 0x4a2   : > { %v1547_v37 = vpop.permute.xlu1 %1546 }
 0x4a3   : > { %v1553_v38 = vsel %vm1552_vm4, %v1551_v36, %v1547_v37 }
 0x4a4   : > { %3581 = vmatmul.mubr.msk.f32.vlgmr.msra.gmra.mxu0 %vm650_vm1, %v1553_v38 }
 0x4a5   : > { %3626 = vmatprep.mubr.msk.f32.mxu0 %vm3924_vm0, %v3923_v1  ;;  %3595 = vmatpush3.msra.mxu0 %v640_v53 }
 0x4a6   : > { %3596 = vmatprep.subr.mxu0 %v3923_v1 }
 0x4a7   : > { %3597 = vmatpush3.msra.mxu0 %v639_v54 }
 0x4a8   : > { %3598 = vmatprep.subr.mxu0 %v3923_v1 }
 0x4a9   : > { %3599 = vmatpush3.msra.mxu0 %v638_v55 }
 0x4aa   : > { %3600 = vmatprep.subr.mxu0 %v3923_v1 }
 0x4ab   : > { %3601 = vmatpush3.msra.mxu0 %v637_v56  ;;  %v3348_v56 = vld [vmem:[%s4729_s4 + $0x1] ss:$0 sm:$0xff]  ;;  %s3931_s4 = smov [#allocation2]  }
 0x4ac   : > { %3602 = vmatprep.subr.mxu0 %v3923_v1 }
 0x4ad   : > { %3603 = vmatpush3.msra.mxu0 %v636_v57 }
 0x4ae   : > { %3604 = vmatprep.subr.mxu0 %v3923_v1 }
 0x4af   : > { %3605 = vmatpush3.msra.mxu0 %v635_v58 }
 0x4b0   : > { %3606 = vmatprep.subr.mxu0 %v3923_v1 }
 0x4b1   : > { %3607 = vmatpush3.msra.mxu0 %v634_v59 }
 0x4b2   : > { %3608 = vmatprep.subr.mxu0 %v3923_v1 }
 0x4b3   : > { %3609 = vmatpush3.msra.mxu0 %v633_v60 }
 0x4b4   : > { %3610 = vmatprep.subr.mxu0 %v3923_v1 }
 0x4b5   : > { %3611 = vmatpush3.msra.mxu0 %v632_v61 }
 0x4b6   : > { %3612 = vmatprep.subr.mxu0 %v3923_v1 }
 0x4b7   : > { %3613 = vmatpush3.msra.mxu0 %v631_v62 }
 0x4b8   : > { %3614 = vmatprep.subr.mxu0 %v3923_v1 }
 0x4b9   : > { %3615 = vmatpush3.msra.mxu0 %v630_v63 }
 0x4ba   : > { %3616 = vmatprep.subr.mxu0 %v3923_v1 }
 0x4bb   : > { %3617 = vmatpush3.msra.mxu0 %v629_v0  ;;  %v3350_v0 = vld [vmem:[%s4732_s6 + $0x1] ss:$0 sm:$0xff] }
 0x4bc   : > { %3618 = vmatprep.subr.mxu0 %v3923_v1 }
 0x4bd   : > { %3619 = vmatpush3.msra.mxu0 %v628_v2 }
 0x4be   : > { %3620 = vmatprep.subr.mxu0 %v3923_v1 }
 0x4bf   : > { %3621 = vmatpush3.msra.mxu0 %v627_v13 }
 0x4c0   : > { %3622 = vmatprep.subr.mxu0 %v3923_v1 }
 0x4c1   : > { %3623 = vmatpush3.msra.mxu0 %v626_v14 }
 0x4c2   : > { %3624 = vmatprep.subr.mxu0 %v3923_v1 }
 0x4c3   : > { %3625 = vmatpush3.msra.mxu0 %v625_v15 }
 0x4c4   : > { %3672 = vmatprep.subr.mxu0 %v3923_v1 }
 0x564   : > { %v1629_v40 = vpop.f32.mrf.mxu0 }
 0x565   : > { %v1630_v41 = vadd.f32 %v3291_v39, %v1629_v40  ;;  %v3298_v40 = vld [vmem:[%s4689_s15] ss:$0 sm:$0xff] }
 0x566   : > { %v3582_v42 = vpop.f32.mrf.mxu0 }
 0x567   : > { %v1633_v43 = vadd.f32 %v1630_v41, %v4105_v5  ;;  %v621_v5 = vld [vmem:[%s4685_s11 + $0x8] sm:$0xff]  ;;  %v3299_v42 = vld [vmem:[%s4690_s16] ss:$0 sm:$0xff] }
 0x568   : > { %3588 = vmatpush3.msra.mxu1 %v621_v5  ;;  %v3310_v5 = vld [vmem:[%s4731_s5 + $0x20] sm:$0xff] }
 0x569   : > { %v1634_v44 = vsel %vm650_vm1, %v1633_v43, 0.0  ;;  %3589 = vmatprep.subr.mxu1 %v3923_v1 }
 0x56a   : > { %1635 = vadd.xlane.f32.xlu0 %v1634_v44  ;;  %3590 = vmatpush3.msra.mxu1 %v620_v52  ;;  %v3346_v52 = vld [vmem:[%s4730_s28 + $0x1] ss:$0 sm:$0xff] }
 0x56b   : > { %3629 = vmatprep.subr.mxu1 %v3923_v1 }
 0x5f3   : > { %v1636_v45 = vpop.xlane.xlu0 %1635 }
 0x5f4   : > { %v1638_v46 = vmul.f32 0.03125, %v1636_v45  ;;  %v3308_v45 = vld [vmem:[%s4728_s19 + $0x38] sm:$0xff] }
 0x5f6   : > { %v1639_v47 = vsub.f32 %v1633_v43, %v1638_v46  ;;  %v3307_v46 = vld [vmem:[%s4728_s19 + $0x30] sm:$0xff] }
 0x5f8   : > { %v1640_v48 = vmul.f32 %v1639_v47, %v1639_v47 }
 0x5fa   : > { %v1641_v49 = vsel %vm650_vm1, %v1640_v48, 0.0  ;;  %v3305_v48 = vld [vmem:[%s4728_s19 + $0x20] sm:$0xff] }
 0x5fb   : > { %1642 = vadd.xlane.f32.xlu1 %v1641_v49  ;;  %v3313_v49 = vld [vmem:[%s4731_s5 + $0x38] sm:$0xff]  ;;  %s3865_s5 = sshll.u32 %s3931_s4, 4  ;;  %s3866_s5 = int_to_ptr.vmem [resolvable:$false] %s3865_s5 }
 0x5fc   : > { %s3867_s1 = scalar_lea.vmem %s3866_s5, 32 }
 0x684   : > { %v1643_v3 = vpop.xlane.xlu1 %1642 }
 0x685   : > { %v1644_v4 = vmul.f32 0.03125, %v1643_v3 }
 0x687   : > { %v1645_v6 = vadd.f32 1e-05, %v1644_v4 }
 0x689   : > { %3833 = vrsqrt.f32 %v1645_v6 }
 0x696   : > { %v3834_v7 = vpop.eup %3833 }
 0x697   : > { %v1647_v9 = vmul.f32 %v3834_v7, %v1639_v47  ;;  %v3306_v47 = vld [vmem:[%s4728_s19 + $0x28] sm:$0xff] }
 0x699   : > { %v1654_v11 = vmul.f32 %v3293_v8, %v1647_v9 }
 0x69b   : > { %v1661_v12 = vadd.f32 %v3294_v10, %v1654_v11 }
 0x69d   : > { %3592 = vmatmul.mubr.msk.f32.vlgmr.msra.gmra.mxu1 %vm650_vm1, %v1661_v12 }
 0x69e   : > { %3637 = vmatprep.mubr.msk.f32.mxu1 %vm3924_vm0, %v3923_v1  ;;  %3630 = vmatpush3.msra.mxu1 %v3303_v32 }
 0x69f   : > { %3631 = vmatprep.subr.mxu1 %v3923_v1 }
 0x6a0   : > { %3632 = vmatpush3.msra.mxu1 %v3302_v33 }
 0x6a1   : > { %3633 = vmatprep.subr.mxu1 %v3923_v1 }
 0x6a2   : > { %3634 = vmatpush3.msra.mxu1 %v3301_v34 }
 0x6a3   : > { %3635 = vmatprep.subr.mxu1 %v3923_v1 }
 0x6a4   : > { %3636 = vmatpush3.msra.mxu1 %v3300_v35 }
 0x6a5   : > { %3640 = vmatprep.subr.mxu1 %v3923_v1 }
 0x75d   : > { %v1737_v17 = vpop.f32.mrf.mxu1 }
 0x75e   : > { %v1738_v18 = vadd.f32 %v3295_v16, %v1737_v17 }
 0x75f   : > { %v3593_v19 = vpop.f32.mrf.mxu1 }
 0x760   : > { %v1741_v20 = vmax.f32 %v1738_v18, 0.0 }
 0x762   : > { %3627 = vmatmul.mubr.f32.vlgmr.msra.gmra.mxu0 %v1741_v20 }
 0x763   : > { %3674 = vmatprep.mubr.msk.f32.mxu0 %vm3924_vm0, %v3923_v1 }
 0x822   : > { %v1814_v22 = vpop.f32.mrf.mxu0 }
 0x823   : > { %v1815_v23 = vadd.f32 %v3297_v21, %v1814_v22 }
 0x824   : > { %v3628_v24 = vpop.f32.mrf.mxu0 }
 0x825   : > { %v1818_v25 = vadd.f32 %v1815_v23, %v1661_v12 }
 0x827   : > { %v1819_v26 = vsel %vm650_vm1, %v1818_v25, 0.0 }
 0x828   : > { %1820 = vadd.xlane.f32.xlu0 %v1819_v26 }
 0x8b1   : > { %v1821_v27 = vpop.xlane.xlu0 %1820 }
 0x8b2   : > { %v1822_v28 = vmul.f32 0.03125, %v1821_v27 }
 0x8b4   : > { %v1823_v29 = vsub.f32 %v1818_v25, %v1822_v28 }
 0x8b6   : > { %v1824_v30 = vmul.f32 %v1823_v29, %v1823_v29 }
 0x8b8   : > { %v1825_v31 = vsel %vm650_vm1, %v1824_v30, 0.0 }
 0x8b9   : > { %1826 = vadd.xlane.f32.xlu0 %v1825_v31 }
 0x942   : > { %v1827_v36 = vpop.xlane.xlu0 %1826 }
 0x943   : > { %v1828_v37 = vmul.f32 0.03125, %v1827_v36 }
 0x945   : > { %v1829_v38 = vadd.f32 1e-05, %v1828_v37 }
 0x947   : > { %3835 = vrsqrt.f32 %v1829_v38 }
 0x954   : > { %v3836_v39 = vpop.eup %3835 }
 0x955   : > { %v1831_v41 = vmul.f32 %v3836_v39, %v1823_v29 }
 0x957   : > { %v1838_v43 = vmul.f32 %v3298_v40, %v1831_v41 }
 0x959   : > { %v4367_v44 = vadd.f32 %v3299_v42, %v1838_v43 }
 0x95b   : > { %3638 = vmatmul.mubr.msk.f32.vlgmr.msra.gmra.mxu1 %vm650_vm1, %v4367_v44 }
 0x95c   : > { %3641 = vmatpush3.msra.mxu1 %v3308_v45  ;;  %3648 = vmatprep.mubr.msk.f32.mxu1 %vm3924_vm0, %v3923_v1 }
 0x95d   : > { %3642 = vmatprep.subr.mxu1 %v3923_v1 }
 0x95e   : > { %3643 = vmatpush3.msra.mxu1 %v3307_v46 }
 0x95f   : > { %3644 = vmatprep.subr.mxu1 %v3923_v1 }
 0x960   : > { %3645 = vmatpush3.msra.mxu1 %v3306_v47 }
 0x961   : > { %3646 = vmatprep.subr.mxu1 %v3923_v1 }
 0x962   : > { %3647 = vmatpush3.msra.mxu1 %v3305_v48 }
 0x963   : > { %3649 = vmatmul.mubr.msk.f32.vlgmr.msra.gmra.mxu1 %vm650_vm1, %v4367_v44  ;;  %3651 = vmatprep.subr.mxu1 %v3923_v1 }
 0x964   : > { %3652 = vmatpush3.msra.mxu1 %v3313_v49  ;;  %3659 = vmatprep.mubr.msk.f32.mxu1 %vm3924_vm0, %v3923_v1 }
 0x965   : > { %3653 = vmatprep.subr.mxu1 %v3923_v1 }
 0x966   : > { %3654 = vmatpush3.msra.mxu1 %v3312_v50 }
 0x967   : > { %3655 = vmatprep.subr.mxu1 %v3923_v1 }
 0x968   : > { %3656 = vmatpush3.msra.mxu1 %v3311_v51 }
 0x969   : > { %3657 = vmatprep.subr.mxu1 %v3923_v1 }
 0x96a   : > { %3658 = vmatpush3.msra.mxu1 %v3310_v5 }
 0x96b   : > { %3660 = vmatmul.mubr.msk.f32.vlgmr.msra.gmra.mxu1 %vm650_vm1, %v4367_v44  ;;  %3662 = vmatprep.subr.mxu1 %v3923_v1 }
 0x96c   : > { %3664 = vmatprep.mubr.msk.f32.mxu1 %vm3924_vm0, %v3923_v1 }
 0xa1b   : > { %v1983_v53 = vpop.f32.mrf.mxu1 }
 0xa1c   : > { %v1984_v54 = vadd.f32 %v3346_v52, %v1983_v53 }
 0xa1d   : > { %v3639_v55 = vpop.f32.mrf.mxu1 }
 0xa1e   : > { %2140 = vrot.lane.b32.xlu0 %v1984_v54, %s3926_s24 }
 0xa22   : > { %2142 = vrot.lane.b32.xlu0 %v1984_v54, %s3925_s25 }
 0xa23   : > { %v2059_v57 = vpop.f32.mrf.mxu1 }
 0xa24   : > { %v2060_v58 = vadd.f32 %v3348_v56, %v2059_v57 }
 0xa25   : > { %v3650_v59 = vpop.f32.mrf.mxu1 }
 0xa26   : > { %2147 = vrot.lane.b32.xlu1 %v2060_v58, %s3926_s24  ;;  %3663 = vmatpush3.xpose.msk.msra.mxu1 %vm900_vm2, %v2060_v58 }
 0xa27   : > { %3667 = vmatprep.subr.mxu1 %v3923_v1 }
 0xa29   : > { %3665 = vmatmul.mubr.msk.f32.vlgmr.msra.gmra.mxu1 %vm900_vm2, %v1984_v54 }
 0xa2a   : > { %2149 = vrot.lane.b32.xlu1 %v2060_v58, %s3925_s25  ;;  %3669 = vmatprep.mubr.msk.f32.mxu1 %vm3924_vm0, %v3923_v1 }
 0xa2b   : > { %v2135_v60 = vpop.f32.mrf.mxu1 }
 0xa2c   : > { %v4440_v3 = vadd.f32 %v3350_v0, %v2135_v60  ;;  %v3315_v0 = vld [vmem:[%s4681_s7 + $0x20] sm:$0xff] }
 0xa2d   : > { %v3661_v61 = vpop.f32.mrf.mxu1 }
 0xa2e   : > { %2151 = vrot.lane.b32.xlu1 %v2060_v58, %s4733_s21  ;;  %v3318_v61 = vld [vmem:[%s4681_s7 + $0x38] sm:$0xff] }
 0xa32   : > { %2144 = vrot.lane.b32.xlu1 %v1984_v54, %s4733_s21 }
 0xa90   : > { %v2141_v63 = vpop.permute.xlu0 %2140 }
 0xa94   : > { %v2143_v4 = vpop.permute.xlu0 %2142 }
 0xa98   : > { %v2148_v62 = vpop.permute.xlu1 %2147 }
 0xa99   : > { %3668 = vmatpush3.xpose.msk.msra.mxu1 %vm900_vm2, %v2148_v62  ;;  %v3317_v62 = vld [vmem:[%s4681_s7 + $0x30] sm:$0xff] }
 0xa9a   : > { %3677 = vmatprep.subr.mxu1 %v3923_v1 }
 0xa9c   : > { %v2150_v2 = vpop.permute.xlu1 %2149  ;;  %3670 = vmatmul.mubr.msk.f32.vlgmr.msra.gmra.mxu1 %vm900_vm2, %v2141_v63  ;;  %v3316_v63 = vld [vmem:[%s4681_s7 + $0x28] sm:$0xff] }
 0xa9d   : > { %3673 = vmatpush3.xpose.msk.msra.mxu0 %vm900_vm2, %v2150_v2  ;;  %3679 = vmatprep.mubr.msk.f32.mxu1 %vm3924_vm0, %v3923_v1 }
 0xa9e   : > { %3682 = vmatprep.subr.mxu0 %v3923_v1 }
 0xaa0   : > { %3675 = vmatmul.mubr.msk.f32.vlgmr.msra.gmra.mxu0 %vm900_vm2, %v2143_v4  ;;  %v2152_v6 = vpop.permute.xlu1 %2151 }
 0xaa1   : > { %3678 = vmatpush3.xpose.msk.msra.mxu1 %vm900_vm2, %v2152_v6  ;;  %3683 = vmatpush3.msra.mxu0 %v4440_v3 }
 0xaa2   : > { %3687 = vmatprep.subr.mxu1 %v3923_v1  ;;  %3684 = vmatprep.mubr.msk.f32.mxu0 %vm3924_vm0, %v3923_v1 }
 0xaa3   : > { %3692 = vmatprep.subr.mxu0 %v3923_v1 }
 0xaa4   : > { %v2145_v7 = vpop.permute.xlu1 %2144 }
 0xaa5   : > { %3680 = vmatmul.mubr.msk.f32.vlgmr.msra.gmra.mxu1 %vm900_vm2, %v2145_v7 }
 0xaa6   : > { %3689 = vmatprep.mubr.msk.f32.mxu1 %vm3924_vm0, %v3923_v1 }
 0xae9   : > { %v2233_v8 = vpop.f32.mrf.mxu1 }
 0xaea   : > { %v2459_v9 = vmul.f32 0.35355338, %v2233_v8 }
 0xaeb   : > { %v3666_v10 = vpop.f32.mrf.mxu1 }
 0xaec   : > { %v2463_v11 = vsel %vm900_vm2, %v2459_v9, -inf }
 0xaed   : > { %2464 = vmax.xlane.f32.xlu0 %v2463_v11 }
 0xb5c   : > { %v2307_v12 = vpop.f32.mrf.mxu1 }
 0xb5d   : > { %v2460_v13 = vmul.f32 0.35355338, %v2307_v12 }
 0xb5e   : > { %v3671_v14 = vpop.f32.mrf.mxu1 }
 0xb5f   : > { %v2466_v15 = vsel %vm900_vm2, %v2460_v13, -inf }
 0xb60   : > { %v2381_v16 = vpop.f32.mrf.mxu0  ;;  %2467 = vmax.xlane.f32.xlu1 %v2466_v15  ;;  %v3364_v15 = vld [vmem:[%s4682_s8 + $0x1] ss:$0 sm:$0xff] }
 0xb61   : > { %v2461_v17 = vmul.f32 0.35355338, %v2381_v16 }
 0xb62   : > { %v3676_v18 = vpop.f32.mrf.mxu0 }
 0xb63   : > { %v2469_v19 = vsel %vm900_vm2, %v2461_v17, -inf }
 0xb64   : > { %2470 = vmax.xlane.f32.xlu0 %v2469_v19 }
 0xb65   : > { %v2455_v20 = vpop.f32.mrf.mxu1 }
 0xb66   : > { %v2462_v21 = vmul.f32 0.35355338, %v2455_v20 }
 0xb67   : > { %v3681_v22 = vpop.f32.mrf.mxu1 }
 0xb68   : > { %v2472_v23 = vsel %vm900_vm2, %v2462_v21, -inf }
 0xb69   : > { %2473 = vmax.xlane.f32.xlu0 %v2472_v23 }
 0xb71   : > { %2154 = vrot.lane.b32.xlu1 %v4440_v3, %s3926_s24  ;;  %s4737_s24 = sld [smem:[#allocation18_spill]] }
 0xb76   : > { %v2465_v24 = vpop.xlane.xlu0 %2464 }
 0xb77   : > { %v2475_v25 = vsub.f32 %v2459_v9, %v2465_v24  ;;  %s4639_s20 = scalar_lea.hbm %s4737_s24, %s3375_s23 }
 0xb79   : > { %v2479_v26 = vmul.f32 1.442695, %v2475_v25 }
 0xb7b   : > { %3837 = vpow2.f32 %v2479_v26  ;;  %v3325_v26 = vld [vmem:[%s4685_s11 + $0x38] sm:$0xff] }
 0xb88   : > { %v3838_v27 = vpop.eup %3837 }
 0xb89   : > { %v2487_v28 = vsel %vm900_vm2, %v3838_v27, 0.0 }
 0xb95   : > { %2488 = vadd.xlane.f32.xlu1 %v2487_v28  ;;  %v3322_v28 = vld [vmem:[%s4685_s11 + $0x20] sm:$0xff] }
 0xbe9   : > { %v2468_v29 = vpop.xlane.xlu1 %2467 }
 0xbea   : > { %v2476_v30 = vsub.f32 %v2460_v13, %v2468_v29  ;;  %v3342_v29 = vld [vmem:[%s4687_s13 + $0xf8] sm:$0xff] }
 0xbec   : > { %v2481_v31 = vmul.f32 1.442695, %v2476_v30  ;;  %v3341_v30 = vld [vmem:[%s4687_s13 + $0xf0] sm:$0xff] }
 0xbed   : > { %v2471_v32 = vpop.xlane.xlu0 %2470  ;;  %v2155_v33 = vpop.permute.xlu1 %2154 }
 0xbee   : > { %3839 = vpow2.f32 %v2481_v31  ;;  %v2477_v34 = vsub.f32 %v2461_v17, %v2471_v32  ;;  %3688 = vmatpush3.msra.mxu1 %v2155_v33  ;;  %v3340_v31 = vld [vmem:[%s4687_s13 + $0xe8] sm:$0xff]  ;;  %v3339_v32 = vld [vmem:[%s4687_s13 + $0xe0] sm:$0xff]  ;;  %v3338_v33 = vld [vmem:[%s4687_s13 + $0xd8] sm:$0xff] }
 0xbef   : > { %3697 = vmatprep.subr.mxu1 %v3923_v1 }
 0xbf0   : > { %v2483_v35 = vmul.f32 1.442695, %v2477_v34  ;;  %v3337_v34 = vld [vmem:[%s4687_s13 + $0xd0] sm:$0xff] }
 0xbf2   : > { %3841 = vpow2.f32 %v2483_v35  ;;  %v2474_v36 = vpop.xlane.xlu0 %2473  ;;  %v3336_v35 = vld [vmem:[%s4687_s13 + $0xc8] sm:$0xff] }
 0xbf3   : > { %v2478_v37 = vsub.f32 %v2462_v21, %v2474_v36  ;;  %v3335_v36 = vld [vmem:[%s4687_s13 + $0xc0] sm:$0xff] }
 0xbf5   : > { %v2485_v38 = vmul.f32 1.442695, %v2478_v37  ;;  %v3334_v37 = vld [vmem:[%s4687_s13 + $0xb8] sm:$0xff] }
 0xbf7   : > { %3843 = vpow2.f32 %v2485_v38  ;;  %v3333_v38 = vld [vmem:[%s4687_s13 + $0xb0] sm:$0xff] }
 0xbfb   : > { %v3840_v39 = vpop.eup %3839 }
 0xbfc   : > { %v2490_v40 = vsel %vm900_vm2, %v3840_v39, 0.0 }
 0xbfd   : > { %2491 = vadd.xlane.f32.xlu0 %v2490_v40  ;;  %v3331_v40 = vld [vmem:[%s4687_s13 + $0xa0] sm:$0xff] }
 0xbff   : > { %v3842_v41 = vpop.eup %3841 }
 0xc00   : > { %v2493_v42 = vsel %vm900_vm2, %v3842_v41, 0.0 }
 0xc01   : > { %2494 = vadd.xlane.f32.xlu1 %v2493_v42 }
 0xc04   : > { %v3844_v43 = vpop.eup %3843 }
 0xc05   : > { %v2496_v45 = vsel %vm900_vm2, %v3844_v43, 0.0 }
 0xc06   : > { %2497 = vadd.xlane.f32.xlu0 %v2496_v45 }
 0xc12   : > { %2160 = vrot.lane.b32.xlu1 %v4440_v3, %s4733_s21  ;;  %s592_s21 = scalar_lea.vmem [#allocation2], %s591_s26 }
 0xc1c   : > { %2157 = vrot.lane.b32.xlu0 %v4440_v3, %s3925_s25  ;;  %s4736_s25 = smov 24  }
 0xc1e   : > { %v2489_v46 = vpop.xlane.xlu1 %2488 }
 0xc1f   : > { %3845 = vrcp.f32 %v2489_v46 }
 0xc2c   : > { %v3846_v47 = vpop.eup %3845 }
 0xc2d   : > { %v2503_v48 = vmul.f32 %v3846_v47, %v3838_v27  ;;  %v3324_v27 = vld [vmem:[%s4685_s11 + $0x30] sm:$0xff]  ;;  %v3366_v47 = vld [vmem:[%s4683_s9 + $0x1] ss:$0 sm:$0xff] }
 0xc2f   : > { %3685 = vmatmul.mubr.msk.f32.vlgmr.msra.gmra.mxu0 %vm900_vm2, %v2503_v48 }
 0xc30   : > { %3694 = vmatprep.mubr.msk.f32.mxu0 %vm3924_vm0, %v3923_v1 }
 0xc86   : > { %v2492_v49 = vpop.xlane.xlu0 %2491 }
 0xc87   : > { %3847 = vrcp.f32 %v2492_v49  ;;  %v3367_v49 = vld [vmem:[%s4684_s10 + $0x1] ss:$0 sm:$0xff] }
 0xc8a   : > { %v2495_v50 = vpop.xlane.xlu1 %2494 }
 0xc8b   : > { %3849 = vrcp.f32 %v2495_v50 }
 0xc8e   : > { %v2161_v54 = vpop.permute.xlu1 %2160 }
 0xc8f   : > { %v2498_v51 = vpop.xlane.xlu0 %2497 }
 0xc90   : > { %3851 = vrcp.f32 %v2498_v51 }
 0xc93   : > { %v2158_v5 = vpop.permute.xlu0 %2157 }
 0xc94   : > { %v3848_v52 = vpop.eup %3847  ;;  %3693 = vmatpush3.msra.mxu0 %v2158_v5  ;;  %v3329_v5 = vld [vmem:[%s4687_s13 + $0x90] sm:$0xff] }
 0xc95   : > { %v2504_v53 = vmul.f32 %v3848_v52, %v3840_v39  ;;  %3702 = vmatprep.subr.mxu0 %v3923_v1  ;;  %v3332_v39 = vld [vmem:[%s4687_s13 + $0xa8] sm:$0xff] }
 0xc96   : > { %v3328_v52 = vld [vmem:[%s4687_s13 + $0x88] sm:$0xff] }
 0xc97   : > { %3690 = vmatmul.mubr.msk.f32.vlgmr.msra.gmra.mxu1 %vm900_vm2, %v2504_v53  ;;  %v3327_v53 = vld [vmem:[%s4687_s13 + $0x80] sm:$0xff] }
 0xc98   : > { %v3850_v55 = vpop.eup %3849  ;;  %3698 = vmatpush3.msra.mxu1 %v2161_v54  ;;  %3699 = vmatprep.mubr.msk.f32.mxu1 %vm3924_vm0, %v3923_v1  ;;  %v3368_v54 = vld [vmem:[%s4686_s12 + $0x1] ss:$0 sm:$0xff] }
 0xc99   : > { %v2505_v56 = vmul.f32 %v3850_v55, %v3842_v41  ;;  %3713 = vmatprep.subr.mxu1 %v3923_v1  ;;  %v3330_v41 = vld [vmem:[%s4687_s13 + $0x98] sm:$0xff] }
 0xc9b   : > { %3695 = vmatmul.mubr.msk.f32.vlgmr.msra.gmra.mxu0 %vm900_vm2, %v2505_v56 }
 0xc9c   : > { %3710 = vmatprep.mubr.msk.f32.mxu0 %vm3924_vm0, %v3923_v1  ;;  %3703 = vmatpush3.msra.mxu0 %v3318_v61 }
 0xc9d   : > { %v3852_v57 = vpop.eup %3851  ;;  %3704 = vmatprep.subr.mxu0 %v3923_v1 }
 0xc9e   : > { %v2506_v58 = vmul.f32 %v3852_v57, %v3844_v43  ;;  %3705 = vmatpush3.msra.mxu0 %v3317_v62 }
 0xc9f   : > { %3706 = vmatprep.subr.mxu0 %v3923_v1 }
 0xca0   : > { %3700 = vmatmul.mubr.msk.f32.vlgmr.msra.gmra.mxu1 %vm900_vm2, %v2506_v58  ;;  %3707 = vmatpush3.msra.mxu0 %v3316_v63 }
 0xca1   : > { %3721 = vmatprep.mubr.msk.f32.mxu1 %vm3924_vm0, %v3923_v1  ;;  %3708 = vmatprep.subr.mxu0 %v3923_v1 }
 0xca2   : > { %3709 = vmatpush3.msra.mxu0 %v3315_v0  ;;  %3714 = vmatpush3.msra.mxu1 %v3325_v26 }
 0xca3   : > { %3724 = vmatprep.subr.mxu0 %v3923_v1  ;;  %3715 = vmatprep.subr.mxu1 %v3923_v1 }
 0xca4   : > { %3716 = vmatpush3.msra.mxu1 %v3324_v27 }
 0xca5   : > { %3717 = vmatprep.subr.mxu1 %v3923_v1 }
 0xcef   : > { %v2576_v59 = vpop.f32.mrf.mxu0 }
 0xcf1   : > { %v3686_v60 = vpop.f32.mrf.mxu0 }
 0xd57   : > { %v2649_v2 = vpop.f32.mrf.mxu1 }
 0xd58   : > { %2800 = vrot.lane.b32.xlu1 %v2649_v2, %s4734_s2  ;;  %s3213_s2 = sshll.u32 %s592_s21, 4  ;;  %s3214_s2 = int_to_ptr.vmem [resolvable:$true] %s3213_s2 }
 0xd59   : > { %v3691_v3 = vpop.f32.mrf.mxu1  ;;  %s3861_s0 = scalar_lea.vmem %s3214_s2, 16  ;;  %p3868_p0 = scmp.lt.s32.totalorder %s3214_s2, %s3866_s5 }
 0xd5a   : > { %p3862_p11 = scmp.ne.s32.totalorder %s3214_s2, %s3861_s0  ;;  %p3869_p1 = scmp.lt.s32.totalorder %s3867_s1, %s3861_s0 }
 0xd5b   : > { %v2722_v4 = vpop.f32.mrf.mxu0 }
 0xd5c   : > { %2804 = vrot.lane.b32.xlu0 %v2722_v4, %s4735_s27  ;;  %p3863_p12 = pnand %p3862_p11, %p4070_p5  ;;  %p3870_p2 = por %p3869_p1, %p3868_p0 }
 0xd5d   : > { %v3696_v6 = vpop.f32.mrf.mxu0 }
 0xd5e   : > { %p3864_p13 = pneg %p3863_p12 }
 0xd60   : > { %v2795_v7 = vpop.f32.mrf.mxu1  ;;  %p3871_p3 = pnand %p3870_p2, %p3864_p13 }
 0xd61   : > { %2808 = vrot.lane.b32.xlu1 %v2795_v7, %s4736_s25 }
 0xd62   : > { %v3701_v8 = vpop.f32.mrf.mxu1 }
 0xd63   : > { %v3117_v8 = vld [vmem:[%s4691_s17 + $0x18] sm:$0xff] }
 0xdca   : > { %v2801_v9 = vpop.permute.xlu1 %2800 }
 0xdcb   : > { %v2811_v11 = vsel %vm900_vm2, %v2576_v59, %v2801_v9  ;;  %v3370_v59 = vld [vmem:[%s4688_s14 + $0x1] ss:$0 sm:$0xff]  ;;  %v3116_v9 = vld [vmem:[%s4691_s17 + $0x10] sm:$0xff] }
 0xdce   : > { %v2805_v10 = vpop.permute.xlu0 %2804 }
 0xdcf   : > { %v2812_v12 = vsel %vm1550_vm3, %v2811_v11, %v2805_v10  ;;  %v3115_v10 = vld [vmem:[%s4691_s17 + $0x8] sm:$0xff]  ;;  %v3114_v11 = vld [vmem:[%s4691_s17] sm:$0xff] }
 0xdd3   : > { %v2809_v13 = vpop.permute.xlu1 %2808 }
 0xdd4   : > { %v2813_v14 = vsel %vm1552_vm4, %v2812_v12, %v2809_v13 }
 0xdd5   : > { %3711 = vmatmul.mubr.msk.f32.vlgmr.msra.gmra.mxu0 %vm650_vm1, %v2813_v14 }
 0xdd6   : > { %3756 = vmatprep.mubr.msk.f32.mxu0 %vm3924_vm0, %v3923_v1  ;;  %3725 = vmatpush3.msra.mxu0 %v3342_v29 }
 0xdd7   : > { %3726 = vmatprep.subr.mxu0 %v3923_v1 }
 0xdd8   : > { %3727 = vmatpush3.msra.mxu0 %v3341_v30 }
 0xdd9   : > { %3728 = vmatprep.subr.mxu0 %v3923_v1 }
 0xdda   : > { %3729 = vmatpush3.msra.mxu0 %v3340_v31 }
 0xddb   : > { %3730 = vmatprep.subr.mxu0 %v3923_v1 }
 0xddc   : > { %3731 = vmatpush3.msra.mxu0 %v3339_v32 }
 0xddd   : > { %3732 = vmatprep.subr.mxu0 %v3923_v1 }
 0xdde   : > { %3733 = vmatpush3.msra.mxu0 %v3338_v33 }
 0xddf   : > { %3734 = vmatprep.subr.mxu0 %v3923_v1 }
 0xde0   : > { %3735 = vmatpush3.msra.mxu0 %v3337_v34 }
 0xde1   : > { %3736 = vmatprep.subr.mxu0 %v3923_v1 }
 0xde2   : > { %3737 = vmatpush3.msra.mxu0 %v3336_v35 }
 0xde3   : > { %3738 = vmatprep.subr.mxu0 %v3923_v1 }
 0xde4   : > { %3739 = vmatpush3.msra.mxu0 %v3335_v36 }
 0xde5   : > { %3740 = vmatprep.subr.mxu0 %v3923_v1 }
 0xde6   : > { %3741 = vmatpush3.msra.mxu0 %v3334_v37 }
 0xde7   : > { %3742 = vmatprep.subr.mxu0 %v3923_v1 }
 0xde8   : > { %3743 = vmatpush3.msra.mxu0 %v3333_v38 }
 0xde9   : > { %3744 = vmatprep.subr.mxu0 %v3923_v1 }
 0xdea   : > { %3745 = vmatpush3.msra.mxu0 %v3332_v39 }
 0xdeb   : > { %3746 = vmatprep.subr.mxu0 %v3923_v1 }
 0xdec   : > { %3747 = vmatpush3.msra.mxu0 %v3331_v40 }
 0xded   : > { %3748 = vmatprep.subr.mxu0 %v3923_v1 }
 0xdee   : > { %3749 = vmatpush3.msra.mxu0 %v3330_v41 }
 0xdef   : > { %3750 = vmatprep.subr.mxu0 %v3923_v1 }
 0xdf0   : > { %3751 = vmatpush3.msra.mxu0 %v3329_v5 }
 0xdf1   : > { %3752 = vmatprep.subr.mxu0 %v3923_v1 }
 0xdf2   : > { %3753 = vmatpush3.msra.mxu0 %v3328_v52 }
 0xdf3   : > { %3754 = vmatprep.subr.mxu0 %v3923_v1 }
 0xdf4   : > { %3755 = vmatpush3.msra.mxu0 %v3327_v53 }
 0xe95   : > { %v2889_v16 = vpop.f32.mrf.mxu0 }
 0xe96   : > { %v2890_v17 = vadd.f32 %v3364_v15, %v2889_v16  ;;  %v3371_v16 = vld [vmem:[%s4689_s15 + $0x1] ss:$0 sm:$0xff] }
 0xe97   : > { %v3712_v18 = vpop.f32.mrf.mxu0 }
 0xe98   : > { %v2893_v19 = vadd.f32 %v2890_v17, %v4367_v44  ;;  %v3323_v44 = vld [vmem:[%s4685_s11 + $0x28] sm:$0xff]  ;;  %v3372_v18 = vld [vmem:[%s4690_s16 + $0x1] ss:$0 sm:$0xff] }
 0xe99   : > { %3718 = vmatpush3.msra.mxu1 %v3323_v44  ;;  %v3118_v44 = vld [vmem:[%s4692_s18] sm:$0x1] }
 0xe9a   : > { %v2894_v20 = vsel %vm650_vm1, %v2893_v19, 0.0  ;;  %3719 = vmatprep.subr.mxu1 %v3923_v1 }
 0xe9b   : > { %2895 = vadd.xlane.f32.xlu0 %v2894_v20  ;;  %3720 = vmatpush3.msra.mxu1 %v3322_v28 }
 0xe9c   : > { %3759 = vmatprep.subr.mxu1 %v3923_v1 }
 0xf24   : > { %v2896_v21 = vpop.xlane.xlu0 %2895 }
 0xf25   : > { %v2897_v22 = vmul.f32 0.03125, %v2896_v21 }
 0xf27   : > { %v2898_v23 = vsub.f32 %v2893_v19, %v2897_v22 }
 0xf29   : > { %v2899_v24 = vmul.f32 %v2898_v23, %v2898_v23 }
 0xf2b   : > { %v2900_v25 = vsel %vm650_vm1, %v2899_v24, 0.0 }
 0xf2c   : > { %2901 = vadd.xlane.f32.xlu1 %v2900_v25 }
 0xfb5   : > { %v2902_v42 = vpop.xlane.xlu1 %2901 }
 0xfb6   : > { %v2903_v43 = vmul.f32 0.03125, %v2902_v42 }
 0xfb8   : > { %v2904_v45 = vadd.f32 1e-05, %v2903_v43 }
 0xfba   : > { %3853 = vrsqrt.f32 %v2904_v45 }
 0xfc7   : > { %v3854_v46 = vpop.eup %3853 }
 0xfc8   : > { %v2906_v48 = vmul.f32 %v3854_v46, %v2898_v23 }
 0xfca   : > { %v2913_v50 = vmul.f32 %v3366_v47, %v2906_v48 }
 0xfcc   : > { %v2920_v51 = vadd.f32 %v3367_v49, %v2913_v50 }
 0xfce   : > { %3722 = vmatmul.mubr.msk.f32.vlgmr.msra.gmra.mxu1 %vm650_vm1, %v2920_v51 }
 0xfcf   : > { %3767 = vmatprep.mubr.msk.f32.mxu1 %vm3924_vm0, %v3923_v1  ;;  %3760 = vmatpush3.msra.mxu1 %v3117_v8 }
 0xfd0   : > { %3761 = vmatprep.subr.mxu1 %v3923_v1 }
 0xfd1   : > { %3762 = vmatpush3.msra.mxu1 %v3116_v9 }
 0xfd2   : > { %3763 = vmatprep.subr.mxu1 %v3923_v1 }
 0xfd3   : > { %3764 = vmatpush3.msra.mxu1 %v3115_v10 }
 0xfd4   : > { %3765 = vmatprep.subr.mxu1 %v3923_v1 }
 0xfd5   : > { %3766 = vmatpush3.msra.mxu1 %v3114_v11 }
0x108e   : > { %v2996_v55 = vpop.f32.mrf.mxu1 }
0x108f   : > { %v2997_v56 = vadd.f32 %v3368_v54, %v2996_v55 }
0x1090   : > { %v3723_v57 = vpop.f32.mrf.mxu1 }
0x1091   : > { %v3000_v58 = vmax.f32 %v2997_v56, 0.0 }
0x1093   : > { %3757 = vmatmul.mubr.f32.vlgmr.msra.gmra.mxu0 %v3000_v58 }
0x1153   : > { %v3073_v60 = vpop.f32.mrf.mxu0 }
0x1154   : > { %v3074_v61 = vadd.f32 %v3370_v59, %v3073_v60 }
0x1155   : > { %v3758_v62 = vpop.f32.mrf.mxu0 }
0x1156   : > { %v3077_v63 = vadd.f32 %v3074_v61, %v2920_v51 }
0x1158   : > { %v3078_v0 = vsel %vm650_vm1, %v3077_v63, 0.0 }
0x1159   : > { %3079 = vadd.xlane.f32.xlu0 %v3078_v0 }
0x11e2   : > { %v3080_v2 = vpop.xlane.xlu0 %3079 }
0x11e3   : > { %v3081_v3 = vmul.f32 0.03125, %v3080_v2 }
0x11e5   : > { %v3082_v4 = vsub.f32 %v3077_v63, %v3081_v3 }
0x11e7   : > { %v3083_v6 = vmul.f32 %v3082_v4, %v3082_v4 }
0x11e9   : > { %v3084_v7 = vsel %vm650_vm1, %v3083_v6, 0.0 }
0x11ea   : > { %3085 = vadd.xlane.f32.xlu0 %v3084_v7 }
0x1273   : > { %v3086_v12 = vpop.xlane.xlu0 %3085 }
0x1274   : > { %v3087_v13 = vmul.f32 0.03125, %v3086_v12 }
0x1276   : > { %v3088_v14 = vadd.f32 1e-05, %v3087_v13 }
0x1278   : > { %3855 = vrsqrt.f32 %v3088_v14 }
0x1285   : > { %v3856_v15 = vpop.eup %3855 }
0x1286   : > { %v3090_v17 = vmul.f32 %v3856_v15, %v3082_v4 }
0x1288   : > { %v3097_v19 = vmul.f32 %v3371_v16, %v3090_v17 }
0x128a   : > { %v3104_v20 = vadd.f32 %v3372_v18, %v3097_v19 }
0x128c   : > { %v3105_v21 = vsel %vm650_vm1, %v3104_v20, 0.0 }
0x128d   : > { %v3106_v1 = vrot.slane %v3105_v21, 4 }
0x128f   : > { %v3107_v22 = vadd.f32 %v3106_v1, %v3105_v21 }
0x1291   : > { %v3108_v23 = vrot.slane %v3107_v22, 2 }
0x1293   : > { %v3109_v24 = vadd.f32 %v3108_v23, %v3107_v22 }
0x1295   : > { %v3110_v25 = vrot.slane %v3109_v24, 1 }
0x1297   : > { %v3111_v26 = vadd.f32 %v3110_v25, %v3109_v24 }
0x1299   : > { %v3113_v27 = vmul.f32 0.125, %v3111_v26 }
0x129b   : > { %3768 = vmatmul.mubr.msk.f32.vlgmr.msra.gmra.mxu1 %vm650_vm1, %v3113_v27 }
0x135b   : > { %v3188_v28 = vpop.f32.mrf.mxu1 }
0x135c   : > { %v3189_v29 = vadd.f32 %v3188_v28, %v3118_v44 }
0x135d   : > { %v3769_v30 = vpop.f32.mrf.mxu1 }
0x135e   : > { %v3374_v31 = vmul.f32 -1.442695, %v3189_v29 }
0x1360   : > { %3857 = vpow2.f32 %v3374_v31 }
0x136d   : > { %v3858_v32 = vpop.eup %3857 }
0x136e   : > { %v3195_v33 = vadd.f32 1.0, %v3858_v32 }
0x1370   : > { %3859 = vrcp.f32 %v3195_v33 }
0x137d   : > { %v3860_v34 = vpop.eup %3859 }
0x137e   : > { %3199 = vst.msk [vmem:[%s592_s21] sm:$0x1] %vm3198_vm5, %v3860_v34 }
0x137f   : > { %3874 = shalt.err (!%p3871_p3)
}
0x1380   : > { %s3875_s23 = scalar_lea.hbm %s4639_s20, 16  ;;  %s3879_s4 = scalar_lea.hbm %s4737_s24, 32 }
0x1381   : > { %p3876_p4 = scmp.ne.s32.totalorder %s4639_s20, %s3875_s23  ;;  %p3880_p9 = scmp.lt.s32.totalorder %s4639_s20, %s4737_s24 }
0x1382   : > { %p3881_p10 = scmp.lt.s32.totalorder %s3879_s4, %s3875_s23 }
0x1383   : > { %p3877_p7 = pnand %p3876_p4, %p4070_p5 }
0x1384   : > { %p3882_p11 = por %p3881_p10, %p3880_p9 }
0x1385   : > { %p3878_p8 = pneg %p3877_p7 }
0x1387   : > { %p3883_p12 = pnand %p3882_p11, %p3878_p8 }
0x1389   : > { %3886 = shalt.err (!%p3883_p12)
}
0x138a   : > { %3770 = dma.vmem_to_hbm [thread:$0]  (%p4070_p5), %s3214_s2, 16, %s4639_s20, %s3201_s22  }
0x138b PF: > { %s4738_s5 = sld [smem:[#allocation7_spill]] }
0x138c   : > { %s4739_s0 = sld [smem:[#allocation5_spill]] }
0x1391   : > { %p3776_p13 = scmp.ge.s32.totalorder %s4738_s5, 2 }
0x1392   : > { %s3225_s6 = sand.u32 1, %s4739_s0  }
0x1393   : > { %p3773_p0 = pnand %p3776_p13, %p4074_p6  ;;  %s3226_s26 = scalar_lea.sflag [#allocation3], %s3225_s6 }
0x1395   : > { %p3774_p1 = pneg %p3773_p0 }
0x1397   : > { %3904 = dma.done.wait (%p3774_p1), %s3226_s26, 16  }
0x1398   : > { %3906 = vsyncadd (%p3774_p1), %s3226_s26, 4294967280  ;;  %s4741_s21 = sld [smem:[#allocation8_spill]]  ;;  %s4744_s0 = smov %s3913_s30 }
0x1399   : > { %s4742_s23 = sld [smem:[#allocation6_spill]] }
0x139a   : > { %s4743_s20 = sld [smem:[#allocation9_spill]] }
0x139e   : > { %p29_p2 = scmp.ge.s32.totalorder %s4741_s21, 4  }
0x139f   : > { %s4745_s30 = smov %s4742_s23 }
0x13a0   :  { %31 = sbr.rel (!%p29_p2) target bundleno = 12 (0xc), region = 147 }
0x13a5   :  { %3230 = vsyncpa [#allocation3], 1 }
0x13a6   :  { %3232 = vsyncpa [#allocation3 + $0x1], 1 }

</bundles_post_ra>
